<compile_context>
chip_gen: v6e
topology: v6e:2x2x1
jax: 0.10.0
libtpu: 0.0.40
codegen_flags: <defaults>
</compile_context>

<pallas_src>
import numpy as np
import jax
import jax.numpy as jnp
from jax import lax
from jax.experimental import pallas as pl
from jax.experimental.pallas import tpu as pltpu


def self_attn_kernel(gamma_ref, x_ref, wq_ref, bq_ref, wk_ref, bk_ref,
                     wv_ref, bv_ref, o_ref):
    x = x_ref[0]                                            # (C, N) f32, lane-dense N

    # ---- 1x1 convs as (Cout, C) @ (C, N) matmuls; spatial on lanes ----
    q = jnp.dot(wq_ref[...], x, preferred_element_type=jnp.float32) + bq_ref[...]  # (C8, N)
    k = jnp.dot(wk_ref[...], x, preferred_element_type=jnp.float32) + bk_ref[...]  # (C8, N)
    v = jnp.dot(wv_ref[...], x, preferred_element_type=jnp.float32) + bv_ref[...]  # (C,  N)

    # ---- energy[i, j] = sum_c q[c, i] * k[c, j]  -> (N, N), rows = query idx ----
    energy = lax.dot_general(q, k, (((0,), (0,)), ((), ())),
                             preferred_element_type=jnp.float32)

    # ---- row-wise softmax over j (lane-axis reduce) ----
    m = jnp.max(energy, axis=-1, keepdims=True)
    p = jnp.exp(energy - m)
    inv = pl.reciprocal(jnp.sum(p, axis=-1, keepdims=True))  # (N, 1): 1 recip/row
    attn = p * inv                                           # VPU multiply, no divides

    # ---- out[c, i] = sum_j v[c, j] * attn[i, j]  -> (C, N) ----
    out = lax.dot_general(v, attn, (((1,), (1,)), ((), ())),
                          preferred_element_type=jnp.float32)

    # ---- gamma residual, lane-dense store ----
    o_ref[0] = (gamma_ref[0] * out + x).astype(o_ref.dtype)


def self_attn(x_nchw, params):
    """x_nchw: (B, C, W, H) float32. params in PyTorch layouts."""
    wq, bq, wk, bk, wv, bv, gamma = params
    B, C, W, H = x_nchw.shape
    N = W * H
    C8 = wq.shape[0]

    x_flat = x_nchw.reshape(B, C, N)                        # NCHW -> (B, C, N)

    wq_m = wq[:, :, 0, 0]                                   # (C8, C)
    wk_m = wk[:, :, 0, 0]                                   # (C8, C)
    wv_m = wv[:, :, 0, 0]                                   # (C,  C)
    bq_m = bq.reshape(C8, 1)
    bk_m = bk.reshape(C8, 1)
    bv_m = bv.reshape(C, 1)
    gamma_s = gamma.reshape(1).astype(jnp.float32)

    # Full-extent blocks with a constant index_map -> weights stay VMEM-resident
    # across the batch grid (no re-DMA between consecutive identical blocks).
    full = lambda shape: pl.BlockSpec(shape, lambda b: tuple(0 for _ in shape))

    out = pl.pallas_call(
        self_attn_kernel,
        out_shape=jax.ShapeDtypeStruct((B, C, N), jnp.float32),
        grid=(B,),
        in_specs=[
            pl.BlockSpec(memory_space=pltpu.MemorySpace.SMEM),   # gamma scalar
            pl.BlockSpec((1, C, N), lambda b: (b, 0, 0)),        # x (per batch)
            full((C8, C)), full((C8, 1)),                        # Wq, bq
            full((C8, C)), full((C8, 1)),                        # Wk, bk
            full((C, C)), full((C, 1)),                          # Wv, bv
        ],
        out_specs=pl.BlockSpec((1, C, N), lambda b: (b, 0, 0)),
        compiler_params=pltpu.CompilerParams(
            dimension_semantics=("parallel",)),
    )(gamma_s, x_flat, wq_m, bq_m, wk_m, bk_m, wv_m, bv_m)

    return out.reshape(B, C, W, H)                          # back to NCHW


# ---------------- pure-JAX reference (mirrors the PyTorch forward) ----------------
def reference_forward(x, params):
    wq, bq, wk, bk, wv, bv, gamma = params
    B, C, W, H = x.shape
    N = W * H
    xf = x.reshape(B, C, N)

    q = jnp.einsum('oc,bcn->bon', wq[:, :, 0, 0], xf) + bq[None, :, None]
    k = jnp.einsum('oc,bcn->bon', wk[:, :, 0, 0], xf) + bk[None, :, None]
    v = jnp.einsum('oc,bcn->bon', wv[:, :, 0, 0], xf) + bv[None, :, None]

    energy = jnp.einsum('bci,bcj->bij', q, k)               # (B, N, N)
    attn = jax.nn.softmax(energy, axis=-1)
    out = jnp.einsum('bcj,bij->bci', v, attn)               # (B, C, N)
    out = gamma * out + xf
    return out.reshape(B, C, W, H)


if __name__ == "__main__":
    B, C, W, H = 2, 32, 16, 16
    C8 = C // 8

    key = jax.random.PRNGKey(0)
    kx, k1, k2, k3, k4, k5, k6, k7 = jax.random.split(key, 8)

    def uinit(k, shape, fan_in):
        bound = 1.0 / np.sqrt(fan_in)
        return jax.random.uniform(k, shape, jnp.float32, -bound, bound)

    x = jax.random.normal(kx, (B, C, W, H), jnp.float32)

    # PyTorch-layout parameters (Conv2d weight: (out_ch, in_ch, 1, 1)); sn=False, bias=True.
    wq = uinit(k1, (C8, C, 1, 1), C)
    bq = uinit(k2, (C8,), C)
    wk = uinit(k3, (C8, C, 1, 1), C)
    bk = uinit(k4, (C8,), C)
    wv = uinit(k5, (C, C, 1, 1), C)
    bv = uinit(k6, (C,), C)
    # nn.Parameter(torch.zeros(1)) initializes gamma to 0; use a nonzero value here
    # so the attention path actually contributes to the checked output.
    gamma = jax.random.uniform(k7, (1,), jnp.float32, 0.25, 0.75)

    params = (wq, bq, wk, bk, wv, bv, gamma)

    out = jax.block_until_ready(self_attn(x, params))
    ref = jax.block_until_ready(reference_forward(x, params))
    np.testing.assert_allclose(np.asarray(out), np.asarray(ref), rtol=1e-4, atol=1e-4)

    print("KERNEL_OK")
</pallas_src>

<mosaic_0001>
module attributes {stable_mosaic.version = 11 : i64} {
  func.func @self_attn_kernel(%arg0: i32, %arg1: memref<1xf32, #tpu.memory_space<smem>>, %arg2: memref<1x32x256xf32, #tpu.memory_space<vmem>>, %arg3: memref<4x32xf32, #tpu.memory_space<vmem>>, %arg4: memref<4x1xf32, #tpu.memory_space<vmem>>, %arg5: memref<4x32xf32, #tpu.memory_space<vmem>>, %arg6: memref<4x1xf32, #tpu.memory_space<vmem>>, %arg7: memref<32x32xf32, #tpu.memory_space<vmem>>, %arg8: memref<32x1xf32, #tpu.memory_space<vmem>>, %arg9: memref<1x32x256xf32, #tpu.memory_space<vmem>>) attributes {dimension_semantics = [#tpu.dimension_semantics<parallel>], iteration_bounds = array<i64: 2>, scalar_prefetch = 0 : i64, scratch_operands = 0 : i64, tpu.core_type = #tpu.core_type<tc>, window_params = [{transform_indices = @transform_0, window_bounds = array<i64: 1>}, {transform_indices = @transform_1, window_bounds = array<i64: 1, 32, 256>}, {pipeline_mode = #tpu.pipeline_mode<synchronous>, transform_indices = @transform_2, window_bounds = array<i64: 4, 32>}, {pipeline_mode = #tpu.pipeline_mode<synchronous>, transform_indices = @transform_3, window_bounds = array<i64: 4, 1>}, {pipeline_mode = #tpu.pipeline_mode<synchronous>, transform_indices = @transform_4, window_bounds = array<i64: 4, 32>}, {pipeline_mode = #tpu.pipeline_mode<synchronous>, transform_indices = @transform_5, window_bounds = array<i64: 4, 1>}, {pipeline_mode = #tpu.pipeline_mode<synchronous>, transform_indices = @transform_6, window_bounds = array<i64: 32, 32>}, {pipeline_mode = #tpu.pipeline_mode<synchronous>, transform_indices = @transform_7, window_bounds = array<i64: 32, 1>}, {transform_indices = @transform_8, window_bounds = array<i64: 1, 32, 256>}]} {
    %c0 = arith.constant 0 : index
    %c0_0 = arith.constant 0 : index
    %c0_1 = arith.constant 0 : index
    %0 = vector.load %arg2[%c0, %c0_0, %c0_1] : memref<1x32x256xf32, #tpu.memory_space<vmem>>, vector<1x32x256xf32>
    %1 = vector.shape_cast %0 : vector<1x32x256xf32> to vector<32x256xf32>
    %c0_2 = arith.constant 0 : index
    %c0_3 = arith.constant 0 : index
    %2 = vector.load %arg3[%c0_2, %c0_3] : memref<4x32xf32, #tpu.memory_space<vmem>>, vector<4x32xf32>
    %cst = arith.constant dense<0.000000e+00> : vector<4x256xf32>
    %3 = tpu.matmul %2, %1, %cst {dimension_numbers = #tpu.dot_dimension_numbers<[1], [0], [0], [1], [0, 0, 1, 1], [], []>} : vector<4x32xf32>, vector<32x256xf32>, vector<4x256xf32> -> vector<4x256xf32>
    %c0_4 = arith.constant 0 : index
    %c0_5 = arith.constant 0 : index
    %4 = vector.load %arg4[%c0_4, %c0_5] : memref<4x1xf32, #tpu.memory_space<vmem>>, vector<4x1xf32>
    %5 = vector.broadcast %4 : vector<4x1xf32> to vector<4x256xf32>
    %6 = arith.addf %3, %5 : vector<4x256xf32>
    %c0_6 = arith.constant 0 : index
    %c0_7 = arith.constant 0 : index
    %7 = vector.load %arg5[%c0_6, %c0_7] : memref<4x32xf32, #tpu.memory_space<vmem>>, vector<4x32xf32>
    %cst_8 = arith.constant dense<0.000000e+00> : vector<4x256xf32>
    %8 = tpu.matmul %7, %1, %cst_8 {dimension_numbers = #tpu.dot_dimension_numbers<[1], [0], [0], [1], [0, 0, 1, 1], [], []>} : vector<4x32xf32>, vector<32x256xf32>, vector<4x256xf32> -> vector<4x256xf32>
    %c0_9 = arith.constant 0 : index
    %c0_10 = arith.constant 0 : index
    %9 = vector.load %arg6[%c0_9, %c0_10] : memref<4x1xf32, #tpu.memory_space<vmem>>, vector<4x1xf32>
    %10 = vector.broadcast %9 : vector<4x1xf32> to vector<4x256xf32>
    %11 = arith.addf %8, %10 : vector<4x256xf32>
    %c0_11 = arith.constant 0 : index
    %c0_12 = arith.constant 0 : index
    %12 = vector.load %arg7[%c0_11, %c0_12] : memref<32x32xf32, #tpu.memory_space<vmem>>, vector<32x32xf32>
    %cst_13 = arith.constant dense<0.000000e+00> : vector<32x256xf32>
    %13 = tpu.matmul %12, %1, %cst_13 {dimension_numbers = #tpu.dot_dimension_numbers<[1], [0], [0], [1], [0, 0, 1, 1], [], []>} : vector<32x32xf32>, vector<32x256xf32>, vector<32x256xf32> -> vector<32x256xf32>
    %c0_14 = arith.constant 0 : index
    %c0_15 = arith.constant 0 : index
    %14 = vector.load %arg8[%c0_14, %c0_15] : memref<32x1xf32, #tpu.memory_space<vmem>>, vector<32x1xf32>
    %15 = vector.broadcast %14 : vector<32x1xf32> to vector<32x256xf32>
    %16 = arith.addf %13, %15 : vector<32x256xf32>
    %cst_16 = arith.constant dense<0.000000e+00> : vector<256x256xf32>
    %17 = tpu.matmul %6, %11, %cst_16 {dimension_numbers = #tpu.dot_dimension_numbers<[0], [0], [1], [1], [0, 1, 1, 1], [], []>} : vector<4x256xf32>, vector<4x256xf32>, vector<256x256xf32> -> vector<256x256xf32>
    %cst_17 = arith.constant dense<0xFF800000> : vector<256xf32>
    %18 = vector.multi_reduction <maximumf>, %17, %cst_17 [1] : vector<256x256xf32> to vector<256xf32>
    %19 = vector.shape_cast %18 : vector<256xf32> to vector<256x1xf32>
    %20 = vector.broadcast %19 : vector<256x1xf32> to vector<256x256xf32>
    %21 = arith.subf %17, %20 : vector<256x256xf32>
    %22 = math.exp %21 : vector<256x256xf32>
    %cst_18 = arith.constant dense<0.000000e+00> : vector<256xf32>
    %23 = vector.multi_reduction <add>, %22, %cst_18 [1] : vector<256x256xf32> to vector<256xf32>
    %24 = vector.shape_cast %23 : vector<256xf32> to vector<256x1xf32>
    %25 = tpu.reciprocal %24 : vector<256x1xf32> -> vector<256x1xf32>
    %26 = vector.broadcast %25 : vector<256x1xf32> to vector<256x256xf32>
    %27 = arith.mulf %22, %26 : vector<256x256xf32>
    %cst_19 = arith.constant dense<0.000000e+00> : vector<32x256xf32>
    %28 = tpu.matmul %16, %27, %cst_19 {dimension_numbers = #tpu.dot_dimension_numbers<[1], [1], [0], [0], [0, 0, 1, 0], [], []>} : vector<32x256xf32>, vector<256x256xf32>, vector<32x256xf32> -> vector<32x256xf32>
    %c0_20 = arith.constant 0 : index
    %29 = memref.load %arg1[%c0_20] : memref<1xf32, #tpu.memory_space<smem>>
    %30 = vector.broadcast %29 : f32 to vector<32x256xf32>
    %31 = arith.mulf %30, %28 : vector<32x256xf32>
    %32 = arith.addf %31, %1 : vector<32x256xf32>
    %c0_21 = arith.constant 0 : index
    %c0_22 = arith.constant 0 : index
    %c0_23 = arith.constant 0 : index
    %33 = vector.load %arg9[%c0_21, %c0_22, %c0_23] : memref<1x32x256xf32, #tpu.memory_space<vmem>>, vector<1x32x256xf32>
    %34 = vector.shape_cast %33 : vector<1x32x256xf32> to vector<32x256xf32>
    %35 = vector.shape_cast %32 : vector<32x256xf32> to vector<1x32x256xf32>
    tpu.vector_store %arg9[%c0_21, %c0_22, %c0_23], %35 {strides = array<i32>} : memref<1x32x256xf32, #tpu.memory_space<vmem>>, vector<1x32x256xf32>,
    return
  }
  func.func @transform_0(%arg0: i32) -> i32 {
    %c0_i32 = arith.constant 0 : i32
    %c0_i32_0 = arith.constant 0 : i32
    return %c0_i32 : i32
  }
  func.func @transform_1(%arg0: i32) -> (i32, i32, i32) {
    %c0_i32 = arith.constant 0 : i32
    %c0_i32_0 = arith.constant 0 : i32
    %c0_i32_1 = arith.constant 0 : i32
    return %arg0, %c0_i32, %c0_i32_0 : i32, i32, i32
  }
  func.func @transform_2(%arg0: i32) -> (i32, i32) {
    %c0_i32 = arith.constant 0 : i32
    %c0_i32_0 = arith.constant 0 : i32
    %c0_i32_1 = arith.constant 0 : i32
    return %c0_i32, %c0_i32_0 : i32, i32
  }
  func.func @transform_3(%arg0: i32) -> (i32, i32) {
    %c0_i32 = arith.constant 0 : i32
    %c0_i32_0 = arith.constant 0 : i32
    %c0_i32_1 = arith.constant 0 : i32
    return %c0_i32, %c0_i32_0 : i32, i32
  }
  func.func @transform_4(%arg0: i32) -> (i32, i32) {
    %c0_i32 = arith.constant 0 : i32
    %c0_i32_0 = arith.constant 0 : i32
    %c0_i32_1 = arith.constant 0 : i32
    return %c0_i32, %c0_i32_0 : i32, i32
  }
  func.func @transform_5(%arg0: i32) -> (i32, i32) {
    %c0_i32 = arith.constant 0 : i32
    %c0_i32_0 = arith.constant 0 : i32
    %c0_i32_1 = arith.constant 0 : i32
    return %c0_i32, %c0_i32_0 : i32, i32
  }
  func.func @transform_6(%arg0: i32) -> (i32, i32) {
    %c0_i32 = arith.constant 0 : i32
    %c0_i32_0 = arith.constant 0 : i32
    %c0_i32_1 = arith.constant 0 : i32
    return %c0_i32, %c0_i32_0 : i32, i32
  }
  func.func @transform_7(%arg0: i32) -> (i32, i32) {
    %c0_i32 = arith.constant 0 : i32
    %c0_i32_0 = arith.constant 0 : i32
    %c0_i32_1 = arith.constant 0 : i32
    return %c0_i32, %c0_i32_0 : i32, i32
  }
  func.func @transform_8(%arg0: i32) -> (i32, i32, i32) {
    %c0_i32 = arith.constant 0 : i32
    %c0_i32_0 = arith.constant 0 : i32
    %c0_i32_1 = arith.constant 0 : i32
    return %arg0, %c0_i32, %c0_i32_0 : i32, i32, i32
  }
}

</mosaic_0001>

<bundles_post_ra>
// kernel: tpu_custom_call.1
= control target key start
LH: loop header
LB: loop body
LE: loop exit
PB: predicated region body
PF: predicated region fallthrough
CT: control target
= control target key end

     0   :  { %s3007_s0 = inlined_call_operand.<no memory space> [shape: f32[1], index: 0, kind: input, shape index: {}]   ;;  %s3008_s1 = inlined_call_operand.hbm [shape: f32[2,32,256], index: 1, kind: input, shape index: {}]   ;;  %s3009_s2 = inlined_call_operand.vmem [shape: f32[4,32], index: 2, kind: input, shape index: {}]   ;;  %s3010_s3 = inlined_call_operand.vmem [shape: f32[4,1], index: 3, kind: input, shape index: {}]   ;;  %s3011_s4 = inlined_call_operand.vmem [shape: f32[4,32], index: 4, kind: input, shape index: {}]   ;;  %s3012_s5 = inlined_call_operand.vmem [shape: f32[4,1], index: 5, kind: input, shape index: {}]   ;;  %s3013_s6 = inlined_call_operand.vmem [shape: f32[32,32], index: 6, kind: input, shape index: {}]   ;;  %s3014_s7 = inlined_call_operand.vmem [shape: f32[32,1], index: 7, kind: input, shape index: {}]   ;;  %s3015_s8 = inlined_call_operand.hbm [shape: f32[2,32,256], index: 8, kind: output, shape index: {}]  }
   0x1   :  { %13 = sst [smem:[#allocation2]] %s3007_s0 }
   0x2   :  { %14 = vsyncpa [#allocation4], 0 }
   0x3   :  { %16 = vsyncpa [#allocation4 + $0x1], 0 }
   0x4   :  { %17 = vsyncpa [#allocation5], 0 }
   0x5   :  { %19 = vsyncpa [#allocation5 + $0x1], 0  ;;  %s2192_s29 = smov 0   ;;  %s2194_s30 = smov 0  }
   0x6   :  { %s2196_s9 = smov 0   ;;  %s2198_s10 = smov 0  }
   0x7 LB: > { %s2213_s0 = sadd.s32 4294967295, %s2134_s10   ;;  %s1732_s11 = sadd.s32 4294967294, %s2134_s10   ;;  %s2134_s10 = sphi %s2198_s10, %s3120_s10   ;;  %s2130_s9 = sphi %s2196_s9, %s3119_s9   ;;  %s2126_s30 = sphi %s2194_s30, %s3118_s30   ;;  %s2122_s29 = sphi %s2192_s29, %s3117_s29  }
   0x8   : > { %s2217_s12 = sadd.s32 1, %s2134_s10   ;;  %s53_s13 = sadd.s32 1, %s2130_s9 }
   0x9   : > { %s50_s14 = ssub.s32 %s2134_s10, %s2217_s12  ;;  %p60_p0 = scmp.ne.s32.totalorder %s2130_s9, %s2126_s30 }
   0xa   : > { %p51_p1 = scmp.eq.s32.totalorder %s50_s14, 0  ;;  %p61_p2 = scmp.eq.s32.totalorder %s2134_s10, 0 }
   0xb   : > { %p66_p3 = scmp.ne.s32.totalorder %s2126_s30, %s2122_s29  ;;  %p67_p4 = scmp.eq.s32.totalorder %s2213_s0, 0 }
   0xc   : > { %s2229_s15 = scalar_select %p51_p1, %s2130_s9, %s53_s13  }
   0xd   : > { %p2231_p5 = por %p61_p2, %p60_p0  ;;  %p2235_p6 = por %p67_p4, %p66_p3 }
   0xe   : > { %p216_p7 = scmp.eq.s32.totalorder %s2213_s0, 1  ;;  %p222_p8 = scmp.eq.s32.totalorder %s1732_s11, 1 }
   0xf   : > { %s3050_s17 = scalar_select %p2235_p6, 1, 0 }
  0x10   : > { %p1800_p10 = scmp.lt.s32.totalorder %s2134_s10, 2  ;;  %p2242_p11 = por %p216_p7, %p60_p0 }
  0x11   : > { %p2246_p12 = por %p222_p8, %p66_p3  ;;  %s263_s20 = sand.u32 1, %s2130_s9  }
  0x12   : > { %s3051_s18 = scalar_select %p2242_p11, 1, 0 }
  0x13   : > { %s3052_s19 = scalar_select %p2246_p12, 1, 0 }
  0x14   : > { %s1786_s21 = sshll.u32 %s2134_s10, 10  ;;  %s1735_s22 = sshll.u32 %s263_s20, 6 }
  0x15   : > { %s2255_s25 = scalar_lea.hbm %s3008_s1, %s1786_s21  ;;  %s267_s26 = scalar_lea.vmem [#allocation3], %s1735_s22 }
  0x16   : > { %s274_s27 = sshll.u32 %s267_s26, 4  ;;  %p2259_p13 = pnand %p1800_p10, %p2231_p5  ;;  %s2263_s27 = int_to_ptr.vmem [resolvable:$true] %s274_s27 }
  0x17   : > { %s2265_s11 = scalar_lea.sflag [#allocation4], %s263_s20  ;;  %s2042_s13 = scalar_lea.hbm %s2255_s25, 1024 }
  0x18   : > { %p2043_p0 = scmp.ne.s32.totalorder %s2255_s25, %s2042_s13  ;;  %p2044_p1 = pneg %p2259_p13 }
  0x19   : > { %s2047_s22 = scalar_lea.hbm %s3008_s1, 2048  ;;  %p2048_p4 = scmp.lt.s32.totalorder %s2255_s25, %s3008_s1 }
  0x1a   : > { %p2045_p2 = pnand %p2044_p1, %p2043_p0  ;;  %p2049_p5 = scmp.lt.s32.totalorder %s2047_s22, %s2042_s13 }
  0x1c   : > { %p2046_p3 = pneg %p2045_p2  ;;  %p2050_p7 = por %p2049_p5, %p2048_p4 }
  0x1e   : > { %p2051_p8 = pnand %p2050_p7, %p2046_p3 }
  0x20   : > { %2054 = shalt.err (!%p2051_p8)
}
  0x21   : > { %s2055_s20 = scalar_lea.vmem %s2263_s27, 1024  ;;  %s2136_s24 = smov [#allocation3]  }
  0x22   : > { %p2056_p10 = scmp.ne.s32.totalorder %s2263_s27, %s2055_s20  ;;  %s2060_s26 = sshll.u32 %s2136_s24, 4  ;;  %s2061_s26 = int_to_ptr.vmem [resolvable:$false] %s2060_s26 }
  0x23   : > { %s2062_s14 = scalar_lea.vmem %s2061_s26, 2048  ;;  %p2063_p2 = scmp.lt.s32.totalorder %s2263_s27, %s2061_s26 }
  0x24   : > { %p2058_p9 = pnand %p2056_p10, %p2044_p1  ;;  %p2064_p12 = scmp.lt.s32.totalorder %s2062_s14, %s2055_s20 }
  0x26   : > { %p2059_p0 = pneg %p2058_p9  ;;  %p2065_p11 = por %p2064_p12, %p2063_p2 }
  0x28   : > { %p2066_p6 = pnand %p2065_p11, %p2059_p0 }
  0x2a   : > { %2069 = shalt.err (!%p2066_p6)
}
  0x2b   : > { %s2137_s13 = smov 256   ;;  %s2138_s21 = smov 16  }
  0x2c   : > { %1795 = dma.hbm_to_vmem [thread:$0]  (!%p2259_p13), %s2255_s25, 1024, %s2263_s27, %s2265_s11, %s2137_s13, %s2137_s13, %s2138_s21  }
  0x2d   : > { %p1738_p9 = scmp.ge.s32.totalorder %s2134_s10, 1  ;;  %p282_p1 = scmp.lt.s32.totalorder %s2134_s10, 3 }
  0x2f   : > { %p283_p3 = pnand %p1738_p9, %p282_p1 }
  0x31   : > { %286 = sbr.rel (%p283_p3) target bundleno = 1378 (0x562), region = 52 }
  0x36   : > { %s2289_s22 = sand.u32 1, %s2126_s30   ;;  %p3054_p6 = scmp.ne.s32.totalorder %s3050_s17, 0 }
  0x37   : > { %s1739_s16 = sshll.u32 %s2289_s22, 6  ;;  %s289_s23 = scalar_lea.sflag [#allocation4], %s2289_s22 }
  0x38   : > { %s2295_s20 = scalar_lea.vmem [#allocation3], %s1739_s16 }
  0x39   : > { %2113 = dma.done.wait (%p3054_p6), %s289_s23, 1024  }
  0x3a   : > { %2115 = vsyncadd (%p3054_p6), %s289_s23, 4294966272  ;;  %v3018_v0 = vmov 0.0   ;;  %v2140_v1 = vmov 0   ;;  %v332_v2 = vld [vmem:[%s2295_s20 + $0x38] sm:$0xff]  ;;  %v331_v3 = vld [vmem:[%s2295_s20 + $0x30] sm:$0xff]  ;;  %vm340_vm0 = vcmask 261120  }
  0x3b   : > { %408 = vmatprep.mubr.f32.mxu0 %v3018_v0  ;;  %1840 = vset.pattern.permute.xlu0 %v2140_v1  ;;  %v330_v4 = vld [vmem:[%s2295_s20 + $0x28] sm:$0xff]  ;;  %v329_v5 = vld [vmem:[%s2295_s20 + $0x20] sm:$0xff]  ;;  %v328_v6 = vld [vmem:[%s2295_s20 + $0x18] sm:$0xff]  ;;  %vm786_vm1 = vcmask 1043456   ;;  %vm689_vm2 = vcmask 31744   ;;  %s1619_s27 = sld [smem:[#allocation2]] }
  0x3c   : > { %857 = vmatprep.mubr.f32.mxu1 %v3018_v0  ;;  %368 = vmatprep.subr.mxu0 %v332_v2  ;;  %v327_v7 = vld [vmem:[%s2295_s20 + $0x10] sm:$0xff]  ;;  %v334_v8 = vld [vmem:[%s3010_s3] sm:$0xf]  ;;  %v326_v9 = vld [vmem:[%s2295_s20 + $0x8] sm:$0xff]  ;;  %s2940_s28 = scalar_lea.vmem [#allocation6], %s1739_s16  ;;  %s1787_s11 = sshll.u32 %s2213_s0, 10 }
  0x3d   : > { %369 = vmatpush1.msra.mxu0 %v331_v3  ;;  %337 = vperm.xlu0 %1840, %v334_v8   ;;  %v325_v10 = vld [vmem:[%s2295_s20] sm:$0xff]  ;;  %s1659_s16 = sshll.u32 %s2940_s28, 4  ;;  %s2961_s14 = scalar_lea.hbm %s3015_s8, %s1787_s11  ;;  %s2954_s16 = int_to_ptr.vmem [resolvable:$true] %s1659_s16 }
  0x3e   : > { %370 = vmatprep.subr.mxu0 %v330_v4  ;;  %v416_v11 = vld [vmem:[%s3012_s5] sm:$0xf]  ;;  %s1646_s0 = scalar_lea.sflag [#allocation5], %s2289_s22  ;;  %s2070_s13 = scalar_lea.vmem %s2954_s16, 1024 }
  0x3f   : > { %371 = vmatpush1.msra.mxu0 %v329_v5  ;;  %v333_v12 = vld [vmem:[%s3009_s2] sm:$0xf]  ;;  %p2071_p11 = scmp.ne.s32.totalorder %s2954_s16, %s2070_s13  ;;  %p3114_p12 = scmp.ne.s32.totalorder %s3051_s18, 0 }
  0x40   : > { %372 = vmatprep.subr.mxu0 %v328_v6  ;;  %v415_v13 = vld [vmem:[%s3011_s4] sm:$0xf]  ;;  %s2141_s21 = smov [#allocation6]  }
  0x41   : > { %373 = vmatpush1.msra.mxu0 %v327_v7  ;;  %419 = vperm.xlu0 %1840, %v416_v11   ;;  %p2072_p13 = pnand %p2071_p11, %p3114_p12  ;;  %s2074_s23 = sshll.u32 %s2141_s21, 4  ;;  %s2075_s23 = int_to_ptr.vmem [resolvable:$false] %s2074_s23 }
  0x42   : > { %374 = vmatprep.subr.mxu0 %v326_v9  ;;  %s2076_s17 = scalar_lea.vmem %s2075_s23, 2048  ;;  %p2077_p5 = scmp.lt.s32.totalorder %s2954_s16, %s2075_s23 }
  0x43   : > { %375 = vmatpush1.msra.mxu0 %v325_v10  ;;  %p2073_p4 = pneg %p2072_p13  ;;  %p2078_p7 = scmp.lt.s32.totalorder %s2076_s17, %s2070_s13 }
  0x44   : > { %1741 = vmatmul.mubr.msk.f32.vlgmr.msra.gmra.mxu0 %vm340_vm0, %v333_v12  ;;  %449 = vmatprep.subr.mxu0 %v332_v2 }
  0x45   : > { %450 = vmatpush1.msra.mxu0 %v331_v3  ;;  %489 = vmatprep.mubr.f32.mxu0 %v3018_v0  ;;  %p2079_p8 = por %p2078_p7, %p2077_p5 }
  0x46   : > { %451 = vmatprep.subr.mxu0 %v330_v4 }
  0x47   : > { %452 = vmatpush1.msra.mxu0 %v329_v5  ;;  %p2080_p10 = pnand %p2079_p8, %p2073_p4 }
  0x48   : > { %453 = vmatprep.subr.mxu0 %v328_v6 }
  0x49   : > { %454 = vmatpush1.msra.mxu0 %v327_v7 }
  0x4a   : > { %455 = vmatprep.subr.mxu0 %v326_v9 }
  0x4b   : > { %456 = vmatpush1.msra.mxu0 %v325_v10 }
  0x4c   : > { %1742 = vmatmul.mubr.msk.f32.vlgmr.msra.gmra.mxu0 %vm340_vm0, %v415_v13  ;;  %560 = vmatprep.subr.mxu0 %v332_v2 }
  0x4d   : > { %561 = vmatpush1.msra.mxu0 %v331_v3  ;;  %600 = vmatprep.mubr.f32.mxu0 %v3018_v0 }
  0x4e   : > { %562 = vmatprep.subr.mxu0 %v330_v4 }
  0x4f   : > { %563 = vmatpush1.msra.mxu0 %v329_v5 }
  0x50   : > { %564 = vmatprep.subr.mxu0 %v328_v6 }
  0x51   : > { %565 = vmatpush1.msra.mxu0 %v327_v7 }
  0x52   : > { %566 = vmatprep.subr.mxu0 %v326_v9 }
  0x53   : > { %567 = vmatpush1.msra.mxu0 %v325_v10 }
  0xb8   : > { %v338_v14 = vpop.permute.xlu0 %337 }
  0xbc   : > { %v420_v19 = vpop.permute.xlu0 %419 }
 0x104   : > { %v410_v15 = vpop.f32.mrf.mxu0 }
 0x105   : > { %v411_v16 = vadd.f32 %v410_v15, %v338_v14 }
 0x106   : > { %v412_v17 = vpop.f32.mrf.mxu0 }
 0x107   : > { %625 = vxpose.xlu1.b32.start.end [1/1] (short) %v411_v16, 128  ;;  %v413_v23 = vadd.f32 %v412_v17, %v338_v14 }
 0x10c   : > { %v491_v18 = vpop.f32.mrf.mxu0 }
 0x10d   : > { %v492_v22 = vadd.f32 %v491_v18, %v420_v19 }
 0x10e   : > { %v493_v20 = vpop.f32.mrf.mxu0 }
 0x10f   : > { %v494_v21 = vadd.f32 %v493_v20, %v420_v19 }
 0x111   : > { %1747 = vmatprep.subr.msk.mxu1 %vm786_vm1, %v494_v21 }
 0x112   : > { %1748 = vmatpush1.msk.msra.mxu1 %vm786_vm1, %v492_v22 }
 0x144   : > { %657 = vxpose.xlu1.b32.start.end [1/1] (short) %v413_v23, 128 }
 0x162   : > { %1841 = vset.pattern.permute.xlu1 %v2140_v1 }
 0x183   : > { %v641_v24 = vpop.trf.xlu1 }
 0x184   : > { %1749 = vmatmul.mubr.msk.f32.vlgmr.msra.gmra.mxu1 %vm689_vm2, %v641_v24 }
 0x185   : > { %863 = vmatprep.mubr.f32.mxu1 %v3018_v0 }
 0x187   : > { %v642_v25 = vpop.trf.xlu1 }
 0x188   : > { %1750 = vmatmul.mubr.msk.f32.gmra.mxu1 %vm689_vm2, %v642_v25 }
 0x189   : > { %869 = vmatprep.mubr.f32.mxu1 %v3018_v0 }
 0x18b   : > { %v643_v26 = vpop.trf.xlu1 }
 0x18c   : > { %1751 = vmatmul.mubr.msk.f32.gmra.mxu1 %vm689_vm2, %v643_v26 }
 0x18d   : > { %875 = vmatprep.mubr.f32.mxu1 %v3018_v0 }
 0x18f   : > { %v644_v27 = vpop.trf.xlu1 }
 0x190   : > { %1752 = vmatmul.mubr.msk.f32.gmra.mxu1 %vm689_vm2, %v644_v27 }
 0x191   : > { %881 = vmatprep.mubr.f32.mxu1 %v3018_v0 }
 0x193   : > { %v645_v28 = vpop.trf.xlu1 }
 0x194   : > { %1753 = vmatmul.mubr.msk.f32.gmra.mxu1 %vm689_vm2, %v645_v28 }
 0x195   : > { %887 = vmatprep.mubr.f32.mxu1 %v3018_v0 }
 0x197   : > { %v646_v29 = vpop.trf.xlu1 }
 0x198   : > { %1754 = vmatmul.mubr.msk.f32.gmra.mxu1 %vm689_vm2, %v646_v29 }
 0x199   : > { %893 = vmatprep.mubr.f32.mxu1 %v3018_v0 }
 0x19b   : > { %v647_v30 = vpop.trf.xlu1 }
 0x19c   : > { %1755 = vmatmul.mubr.msk.f32.gmra.mxu1 %vm689_vm2, %v647_v30 }
 0x19d   : > { %899 = vmatprep.mubr.f32.mxu1 %v3018_v0 }
 0x19f   : > { %v648_v31 = vpop.trf.xlu1 }
 0x1a0   : > { %1756 = vmatmul.mubr.msk.f32.gmra.mxu1 %vm689_vm2, %v648_v31 }
 0x1a1   : > { %905 = vmatprep.mubr.f32.mxu1 %v3018_v0 }
 0x1a3   : > { %v649_v32 = vpop.trf.xlu1 }
 0x1a4   : > { %1757 = vmatmul.mubr.msk.f32.gmra.mxu1 %vm689_vm2, %v649_v32 }
 0x1a5   : > { %911 = vmatprep.mubr.f32.mxu1 %v3018_v0 }
 0x1a7   : > { %v650_v33 = vpop.trf.xlu1 }
 0x1a8   : > { %1758 = vmatmul.mubr.msk.f32.gmra.mxu1 %vm689_vm2, %v650_v33 }
 0x1a9   : > { %917 = vmatprep.mubr.f32.mxu1 %v3018_v0 }
 0x1ab   : > { %v651_v34 = vpop.trf.xlu1 }
 0x1ac   : > { %1759 = vmatmul.mubr.msk.f32.gmra.mxu1 %vm689_vm2, %v651_v34 }
 0x1ad   : > { %923 = vmatprep.mubr.f32.mxu1 %v3018_v0 }
 0x1af   : > { %v652_v35 = vpop.trf.xlu1 }
 0x1b0   : > { %1760 = vmatmul.mubr.msk.f32.gmra.mxu1 %vm689_vm2, %v652_v35 }
 0x1b1   : > { %929 = vmatprep.mubr.f32.mxu1 %v3018_v0 }
 0x1b3   : > { %v653_v36 = vpop.trf.xlu1 }
 0x1b4   : > { %1761 = vmatmul.mubr.msk.f32.gmra.mxu1 %vm689_vm2, %v653_v36 }
 0x1b5   : > { %935 = vmatprep.mubr.f32.mxu1 %v3018_v0 }
 0x1b7   : > { %v654_v37 = vpop.trf.xlu1 }
 0x1b8   : > { %1762 = vmatmul.mubr.msk.f32.gmra.mxu1 %vm689_vm2, %v654_v37 }
 0x1b9   : > { %941 = vmatprep.mubr.f32.mxu1 %v3018_v0 }
 0x1bb   : > { %v655_v38 = vpop.trf.xlu1 }
 0x1bc   : > { %1763 = vmatmul.mubr.msk.f32.gmra.mxu1 %vm689_vm2, %v655_v38 }
 0x1bd   : > { %947 = vmatprep.mubr.f32.mxu1 %v3018_v0 }
 0x1bf   : > { %v656_v39 = vpop.trf.xlu1 }
 0x1c0   : > { %1764 = vmatmul.mubr.msk.f32.gmra.mxu1 %vm689_vm2, %v656_v39 }
 0x1c1   : > { %953 = vmatprep.mubr.f32.mxu1 %v3018_v0 }
 0x1c3   : > { %v673_v40 = vpop.trf.xlu1 }
 0x1c4   : > { %1765 = vmatmul.mubr.msk.f32.gmra.mxu1 %vm689_vm2, %v673_v40 }
 0x1c5   : > { %959 = vmatprep.mubr.f32.mxu1 %v3018_v0 }
 0x1c7   : > { %v674_v41 = vpop.trf.xlu1 }
 0x1c8   : > { %1766 = vmatmul.mubr.msk.f32.gmra.mxu1 %vm689_vm2, %v674_v41 }
 0x1c9   : > { %965 = vmatprep.mubr.f32.mxu1 %v3018_v0 }
 0x1cb   : > { %v675_v42 = vpop.trf.xlu1 }
 0x1cc   : > { %1767 = vmatmul.mubr.msk.f32.gmra.mxu1 %vm689_vm2, %v675_v42 }
 0x1cd   : > { %971 = vmatprep.mubr.f32.mxu1 %v3018_v0 }
 0x1cf   : > { %v676_v43 = vpop.trf.xlu1 }
 0x1d0   : > { %1768 = vmatmul.mubr.msk.f32.gmra.mxu1 %vm689_vm2, %v676_v43 }
 0x1d1   : > { %977 = vmatprep.mubr.f32.mxu1 %v3018_v0 }
 0x1d3   : > { %v677_v44 = vpop.trf.xlu1 }
 0x1d4   : > { %1769 = vmatmul.mubr.msk.f32.gmra.mxu1 %vm689_vm2, %v677_v44 }
 0x1d5   : > { %983 = vmatprep.mubr.f32.mxu1 %v3018_v0 }
 0x1d7   : > { %v678_v45 = vpop.trf.xlu1 }
 0x1d8   : > { %1770 = vmatmul.mubr.msk.f32.gmra.mxu1 %vm689_vm2, %v678_v45 }
 0x1d9   : > { %989 = vmatprep.mubr.f32.mxu1 %v3018_v0 }
 0x1db   : > { %v679_v46 = vpop.trf.xlu1 }
 0x1dc   : > { %1771 = vmatmul.mubr.msk.f32.gmra.mxu1 %vm689_vm2, %v679_v46 }
 0x1dd   : > { %995 = vmatprep.mubr.f32.mxu1 %v3018_v0 }
 0x1df   : > { %v680_v47 = vpop.trf.xlu1 }
 0x1e0   : > { %1772 = vmatmul.mubr.msk.f32.gmra.mxu1 %vm689_vm2, %v680_v47 }
 0x1e1   : > { %1001 = vmatprep.mubr.f32.mxu1 %v3018_v0 }
 0x1e3   : > { %v681_v48 = vpop.trf.xlu1 }
 0x1e4   : > { %1773 = vmatmul.mubr.msk.f32.gmra.mxu1 %vm689_vm2, %v681_v48 }
 0x1e5   : > { %1007 = vmatprep.mubr.f32.mxu1 %v3018_v0 }
 0x1e7   : > { %v682_v49 = vpop.trf.xlu1 }
 0x1e8   : > { %1774 = vmatmul.mubr.msk.f32.gmra.mxu1 %vm689_vm2, %v682_v49 }
 0x1e9   : > { %1013 = vmatprep.mubr.f32.mxu1 %v3018_v0 }
 0x1eb   : > { %v683_v50 = vpop.trf.xlu1 }
 0x1ec   : > { %1775 = vmatmul.mubr.msk.f32.gmra.mxu1 %vm689_vm2, %v683_v50 }
 0x1ed   : > { %1019 = vmatprep.mubr.f32.mxu1 %v3018_v0 }
 0x1ef   : > { %v684_v51 = vpop.trf.xlu1 }
 0x1f0   : > { %1776 = vmatmul.mubr.msk.f32.gmra.mxu1 %vm689_vm2, %v684_v51 }
 0x1f1   : > { %1025 = vmatprep.mubr.f32.mxu1 %v3018_v0 }
 0x1f3   : > { %v685_v52 = vpop.trf.xlu1 }
 0x1f4   : > { %1777 = vmatmul.mubr.msk.f32.gmra.mxu1 %vm689_vm2, %v685_v52 }
 0x1f5   : > { %1031 = vmatprep.mubr.f32.mxu1 %v3018_v0 }
 0x1f7   : > { %v686_v53 = vpop.trf.xlu1 }
 0x1f8   : > { %1778 = vmatmul.mubr.msk.f32.gmra.mxu1 %vm689_vm2, %v686_v53 }
 0x1f9   : > { %1037 = vmatprep.mubr.f32.mxu1 %v3018_v0 }
 0x1fb   : > { %v687_v54 = vpop.trf.xlu1 }
 0x1fc   : > { %1779 = vmatmul.mubr.msk.f32.gmra.mxu1 %vm689_vm2, %v687_v54 }
 0x1fd   : > { %1043 = vmatprep.mubr.f32.mxu1 %v3018_v0 }
 0x1ff   : > { %v688_v55 = vpop.trf.xlu1 }
 0x200   : > { %1780 = vmatmul.mubr.msk.f32.gmra.mxu1 %vm689_vm2, %v688_v55 }
 0x244   : > { %v2390_v56 = vpop.f32.mrf.mxu1 }
 0x246   : > { %v2392_v57 = vpop.f32.mrf.mxu1 }
 0x248   : > { %v2394_v58 = vpop.f32.mrf.mxu1 }
 0x24a   : > { %v2396_v59 = vpop.f32.mrf.mxu1 }
 0x24c   : > { %v2398_v60 = vpop.f32.mrf.mxu1 }
 0x24e   : > { %v2400_v61 = vpop.f32.mrf.mxu1 }
 0x250   : > { %v2402_v62 = vpop.f32.mrf.mxu1 }
 0x252   : > { %v2404_v63 = vpop.f32.mrf.mxu1 }
 0x253   : > { %v1059_v55 = vmax.f32 %v2402_v62, %v2404_v63 }
 0x254   : > { %v2406_v1 = vpop.f32.mrf.mxu1 }
 0x256   : > { %v2408_v2 = vpop.f32.mrf.mxu1 }
 0x257   : > { %v1062_v51 = vmax.f32 %v2406_v1, %v2408_v2 }
 0x258   : > { %v2410_v3 = vpop.f32.mrf.mxu1 }
 0x25a   : > { %v2412_v4 = vpop.f32.mrf.mxu1 }
 0x25b   : > { %v1065_v47 = vmax.f32 %v2410_v3, %v2412_v4 }
 0x25c   : > { %v2414_v5 = vpop.f32.mrf.mxu1 }
 0x25e   : > { %v2416_v6 = vpop.f32.mrf.mxu1 }
 0x25f   : > { %v1068_v42 = vmax.f32 %v2414_v5, %v2416_v6 }
 0x260   : > { %v2418_v7 = vpop.f32.mrf.mxu1 }
 0x262   : > { %v2420_v8 = vpop.f32.mrf.mxu1 }
 0x263   : > { %v1071_v9 = vmax.f32 %v2418_v7, %v2420_v8 }
 0x264   : > { %v2424_v10 = vpop.f32.mrf.mxu1 }
 0x265   : > { %1072 = vmax.xlane.f32.xlu1 %v1071_v9 }
 0x266   : > { %v2426_v11 = vpop.f32.mrf.mxu1 }
 0x267   : > { %v1074_v39 = vmax.f32 %v2424_v10, %v2426_v11 }
 0x268   : > { %v2428_v12 = vpop.f32.mrf.mxu1 }
 0x26a   : > { %v2430_v13 = vpop.f32.mrf.mxu1 }
 0x26b   : > { %v1077_v36 = vmax.f32 %v2428_v12, %v2430_v13 }
 0x26c   : > { %v2432_v14 = vpop.f32.mrf.mxu1 }
 0x26e   : > { %v2434_v15 = vpop.f32.mrf.mxu1 }
 0x26f   : > { %v1080_v33 = vmax.f32 %v2432_v14, %v2434_v15 }
 0x270   : > { %v2436_v16 = vpop.f32.mrf.mxu1 }
 0x272   : > { %v2438_v17 = vpop.f32.mrf.mxu1 }
 0x273   : > { %v1083_v18 = vmax.f32 %v2436_v16, %v2438_v17 }
 0x274   : > { %v2442_v19 = vpop.f32.mrf.mxu1 }
 0x275   : > { %1084 = vmax.xlane.f32.xlu0 %v1083_v18 }
 0x276   : > { %v2444_v20 = vpop.f32.mrf.mxu1 }
 0x277   : > { %v1086_v21 = vmax.f32 %v2442_v19, %v2444_v20 }
 0x278   : > { %v2448_v22 = vpop.f32.mrf.mxu1 }
 0x279   : > { %1087 = vmax.xlane.f32.xlu0 %v1086_v21  ;;  %v1056_v21 = vmax.f32 %v2398_v60, %v2400_v61 }
 0x27a   : > { %v2450_v23 = vpop.f32.mrf.mxu1 }
 0x27b   : > { %v1089_v24 = vmax.f32 %v2448_v22, %v2450_v23 }
 0x27c   : > { %v2454_v25 = vpop.f32.mrf.mxu1 }
 0x27d   : > { %1090 = vmax.xlane.f32.xlu0 %v1089_v24 }
 0x27e   : > { %v2456_v26 = vpop.f32.mrf.mxu1 }
 0x27f   : > { %v1092_v27 = vmax.f32 %v2454_v25, %v2456_v26 }
 0x280   : > { %v2460_v28 = vpop.f32.mrf.mxu1 }
 0x281   : > { %1093 = vmax.xlane.f32.xlu0 %v1092_v27 }
 0x282   : > { %v2462_v29 = vpop.f32.mrf.mxu1 }
 0x283   : > { %v1095_v30 = vmax.f32 %v2460_v28, %v2462_v29 }
 0x284   : > { %v2466_v31 = vpop.f32.mrf.mxu1 }
 0x285   : > { %3055 = vst [vmem:[#allocation9_spill] sm:$0xff] %v2466_v31  ;;  %1096 = vmax.xlane.f32.xlu0 %v1095_v30  ;;  %v1053_v30 = vmax.f32 %v2394_v58, %v2396_v59 }
 0x286   : > { %v2468_v32 = vpop.f32.mrf.mxu1 }
 0x287   : > { %3056 = vst [vmem:[#allocation10_spill] sm:$0xff] %v2468_v32  ;;  %v1098_v53 = vmax.f32 %v2466_v31, %v2468_v32 }
 0x288   : > { %v2472_v34 = vpop.f32.mrf.mxu1 }
 0x289   : > { %3057 = vst [vmem:[#allocation11_spill] sm:$0xff] %v2472_v34  ;;  %1081 = vmax.xlane.f32.xlu0 %v1080_v33 }
 0x28a   : > { %v2474_v35 = vpop.f32.mrf.mxu1 }
 0x28b   : > { %3058 = vst [vmem:[#allocation12_spill] sm:$0xff] %v2474_v35  ;;  %v1101_v49 = vmax.f32 %v2472_v34, %v2474_v35 }
 0x28c   : > { %v2478_v37 = vpop.f32.mrf.mxu1 }
 0x28d   : > { %3059 = vst [vmem:[#allocation13_spill] sm:$0xff] %v2478_v37  ;;  %1078 = vmax.xlane.f32.xlu0 %v1077_v36 }
 0x28e   : > { %v2480_v38 = vpop.f32.mrf.mxu1 }
 0x28f   : > { %3060 = vst [vmem:[#allocation14_spill] sm:$0xff] %v2480_v38  ;;  %v1104_v45 = vmax.f32 %v2478_v37, %v2480_v38  ;;  %v3071_v37 = vmov 0.0  }
 0x290   : > { %v2484_v40 = vpop.f32.mrf.mxu1 }
 0x291   : > { %3061 = vst [vmem:[#allocation15_spill] sm:$0xff] %v2484_v40  ;;  %1075 = vmax.xlane.f32.xlu0 %v1074_v39  ;;  %v1050_v39 = vmax.f32 %v2390_v56, %v2392_v57 }
 0x292   : > { %v2486_v41 = vpop.f32.mrf.mxu1 }
 0x293   : > { %3062 = vst [vmem:[#allocation16_spill] sm:$0xff] %v2486_v41  ;;  %v1107_v43 = vmax.f32 %v2484_v40, %v2486_v41 }
 0x294   : > { %v2492_v44 = vpop.f32.mrf.mxu1 }
 0x295   : > { %1069 = vmax.xlane.f32.xlu0 %v1068_v42  ;;  %1108 = vmax.xlane.f32.xlu1 %v1107_v43 }
 0x296   : > { %v2496_v46 = vpop.f32.mrf.mxu1 }
 0x298   : > { %v2500_v48 = vpop.f32.mrf.mxu1 }
 0x299   : > { %1066 = vmax.xlane.f32.xlu0 %v1065_v47  ;;  %1105 = vmax.xlane.f32.xlu1 %v1104_v45 }
 0x29a   : > { %v2504_v50 = vpop.f32.mrf.mxu1 }
 0x29c   : > { %v2508_v52 = vpop.f32.mrf.mxu1 }
 0x29d   : > { %3063 = vst [vmem:[#allocation17_spill] sm:$0xff] %v2508_v52  ;;  %1063 = vmax.xlane.f32.xlu0 %v1062_v51  ;;  %1102 = vmax.xlane.f32.xlu1 %v1101_v49 }
 0x29e   : > { %v2512_v54 = vpop.f32.mrf.mxu1 }
 0x29f   : > { %3064 = vst [vmem:[#allocation18_spill] sm:$0xff] %v2512_v54 }
 0x2a0   : > { %v2516_v9 = vpop.f32.mrf.mxu1 }
 0x2a1   : > { %3065 = vst [vmem:[#allocation19_spill] sm:$0xff] %v2516_v9  ;;  %1060 = vmax.xlane.f32.xlu0 %v1059_v55  ;;  %1099 = vmax.xlane.f32.xlu1 %v1098_v53 }
 0x2a2   : > { %v2518_v18 = vpop.f32.mrf.mxu1 }
 0x2a3   : > { %3066 = vst [vmem:[#allocation20_spill] sm:$0xff] %v2518_v18  ;;  %v1119_v34 = vmax.f32 %v2516_v9, %v2518_v18 }
 0x2a4   : > { %v2522_v24 = vpop.f32.mrf.mxu1 }
 0x2a5   : > { %3067 = vst [vmem:[#allocation21_spill] sm:$0xff] %v2522_v24  ;;  %1057 = vmax.xlane.f32.xlu0 %v1056_v21 }
 0x2a6   : > { %v2524_v27 = vpop.f32.mrf.mxu1 }
 0x2a7   : > { %3068 = vst [vmem:[#allocation22_spill] sm:$0xff] %v2524_v27 }
 0x2a8   : > { %v2528_v33 = vpop.f32.mrf.mxu1 }
 0x2a9   : > { %3069 = vst [vmem:[#allocation23_spill] sm:$0xff] %v2528_v33  ;;  %1054 = vmax.xlane.f32.xlu0 %v1053_v30 }
 0x2aa   : > { %v2530_v36 = vpop.f32.mrf.mxu1 }
 0x2ab   : > { %3070 = vst [vmem:[#allocation24_spill] sm:$0xff] %v2530_v36  ;;  %v1125_v35 = vmax.f32 %v2528_v33, %v2530_v36 }
 0x2ac   : > { %v2534_v42 = vpop.f32.mrf.mxu1 }
 0x2ad   : > { %1051 = vmax.xlane.f32.xlu0 %v1050_v39 }
 0x2ae   : > { %v2536_v43 = vpop.f32.mrf.mxu1 }
 0x2af   : > { %v1128_v45 = vmax.f32 %v2534_v42, %v2536_v43 }
 0x2b0   : > { %v2540_v47 = vpop.f32.mrf.mxu1 }
 0x2b1   : > { %1129 = vmax.xlane.f32.xlu0 %v1128_v45 }
 0x2b2   : > { %v2542_v49 = vpop.f32.mrf.mxu1 }
 0x2b3   : > { %v1131_v51 = vmax.f32 %v2540_v47, %v2542_v49 }
 0x2b4   : > { %v2546_v53 = vpop.f32.mrf.mxu1 }
 0x2b5   : > { %1132 = vmax.xlane.f32.xlu0 %v1131_v51 }
 0x2b6   : > { %v2548_v55 = vpop.f32.mrf.mxu1 }
 0x2b7   : > { %v1134_v21 = vmax.f32 %v2546_v53, %v2548_v55 }
 0x2b8   : > { %v2552_v30 = vpop.f32.mrf.mxu1 }
 0x2b9   : > { %1135 = vmax.xlane.f32.xlu0 %v1134_v21 }
 0x2ba   : > { %v2554_v39 = vpop.f32.mrf.mxu1 }
 0x2bb   : > { %v1137_v45 = vmax.f32 %v2552_v30, %v2554_v39 }
 0x2bc   : > { %v2558_v0 = vpop.f32.mrf.mxu1 }
 0x2bd   : > { %1138 = vmax.xlane.f32.xlu0 %v1137_v45  ;;  %v1122_v45 = vmax.f32 %v2522_v24, %v2524_v27 }
 0x2be   : > { %v2560_v32 = vpop.f32.mrf.mxu1 }
 0x2bf   : > { %v1140_v51 = vmax.f32 %v2558_v0, %v2560_v32 }
 0x2c0   : > { %v2564_v31 = vpop.f32.mrf.mxu1 }
 0x2c1   : > { %1141 = vmax.xlane.f32.xlu0 %v1140_v51  ;;  %v1116_v51 = vmax.f32 %v2508_v52, %v2512_v54 }
 0x2c2   : > { %v2566_v38 = vpop.f32.mrf.mxu1 }
 0x2c3   : > { %v1143_v21 = vmax.f32 %v2564_v31, %v2566_v38 }
 0x2c5   : > { %1144 = vmax.xlane.f32.xlu0 %v1143_v21  ;;  %v496_v21 = vld [vmem:[%s3013_s6] sm:$0xff] }
 0x2c6   : > { %1743 = vmatmul.mubr.msk.f32.vlgmr.msra.gmra.mxu0 %vm340_vm0, %v496_v21 }
 0x2c7   : > { %606 = vmatprep.mubr.f32.mxu0 %v3071_v37 }
 0x2c9   : > { %1126 = vmax.xlane.f32.xlu0 %v1125_v35 }
 0x2cd   : > { %1123 = vmax.xlane.f32.xlu0 %v1122_v45 }
 0x2d1   : > { %1120 = vmax.xlane.f32.xlu0 %v1119_v34 }
 0x2d5   : > { %1117 = vmax.xlane.f32.xlu0 %v1116_v51 }
 0x2fe   : > { %v1085_v35 = vpop.xlane.xlu0 %1084 }
 0x302   : > { %v1088_v41 = vpop.xlane.xlu0 %1087 }
 0x303   : > { %v1170_v21 = vsub.f32 %v2442_v19, %v1088_v41  ;;  %v1171_v36 = vsub.f32 %v2444_v20, %v1088_v41  ;;  %v1168_v19 = vsub.f32 %v2436_v16, %v1085_v35 }
 0x306   : > { %v1091_v40 = vpop.xlane.xlu0 %1090 }
 0x307   : > { %v1172_v45 = vsub.f32 %v2448_v22, %v1091_v40  ;;  %v1173_v18 = vsub.f32 %v2450_v23, %v1091_v40  ;;  %v1258_v40 = vmul.f32 1.442695, %v1170_v21 }
 0x309   : > { %v1262_v34 = vmul.f32 1.442695, %v1172_v45  ;;  %v1264_v9 = vmul.f32 1.442695, %v1173_v18 }
 0x30a   : > { %v1094_v27 = vpop.xlane.xlu0 %1093 }
 0x30b   : > { %1842 = vpow2.f32 %v1262_v34  ;;  %v1174_v51 = vsub.f32 %v2454_v25, %v1094_v27  ;;  %v1175_v54 = vsub.f32 %v2456_v26, %v1094_v27  ;;  %v1260_v25 = vmul.f32 1.442695, %v1171_v36 }
 0x30c   : > { %1844 = vpow2.f32 %v1264_v9  ;;  %v1169_v26 = vsub.f32 %v2438_v17, %v1085_v35 }
 0x30d   : > { %v1266_v52 = vmul.f32 1.442695, %v1174_v51  ;;  %v1268_v24 = vmul.f32 1.442695, %v1175_v54 }
 0x30e   : > { %v1097_v33 = vpop.xlane.xlu0 %1096 }
 0x30f   : > { %1846 = vpow2.f32 %v1266_v52  ;;  %v1176_v22 = vsub.f32 %v2460_v28, %v1097_v33  ;;  %v1177_v23 = vsub.f32 %v2462_v29, %v1097_v33  ;;  %v1254_v29 = vmul.f32 1.442695, %v1168_v19 }
 0x310   : > { %1848 = vpow2.f32 %v1268_v24  ;;  %v1256_v52 = vmul.f32 1.442695, %v1169_v26 }
 0x311   : > { %v1270_v18 = vmul.f32 1.442695, %v1176_v22  ;;  %v1272_v45 = vmul.f32 1.442695, %v1177_v23 }
 0x312   : > { %v1082_v34 = vpop.xlane.xlu0 %1081 }
 0x313   : > { %1850 = vpow2.f32 %v1270_v18  ;;  %v1166_v27 = vsub.f32 %v2432_v14, %v1082_v34  ;;  %v1167_v17 = vsub.f32 %v2434_v15, %v1082_v34 }
 0x314   : > { %1852 = vpow2.f32 %v1272_v45 }
 0x315   : > { %1854 = vpow2.f32 %v1258_v40  ;;  %v1250_v51 = vmul.f32 1.442695, %v1166_v27  ;;  %v1252_v23 = vmul.f32 1.442695, %v1167_v17 }
 0x316   : > { %1856 = vpow2.f32 %v1260_v25  ;;  %v1079_v20 = vpop.xlane.xlu0 %1078 }
 0x317   : > { %1858 = vpow2.f32 %v1254_v29  ;;  %v1164_v22 = vsub.f32 %v2428_v12, %v1079_v20  ;;  %v1165_v40 = vsub.f32 %v2430_v13, %v1079_v20 }
 0x318   : > { %v2593_v41 = vpop.eup %1842  ;;  %1860 = vpow2.f32 %v1256_v52  ;;  %v1073_v52 = vpop.xlane.xlu1 %1072 }
 0x319   : > { %v2595_v28 = vpop.eup %1844  ;;  %1862 = vpow2.f32 %v1250_v51  ;;  %v1246_v19 = vmul.f32 1.442695, %v1164_v22  ;;  %v1248_v13 = vmul.f32 1.442695, %v1165_v40  ;;  %v1113_v51 = vmax.f32 %v2500_v48, %v2504_v50 }
 0x31a   : > { %v1076_v54 = vpop.xlane.xlu0 %1075  ;;  %v1377_v9 = vadd.f32 %v2595_v28, %v2593_v41  ;;  %1864 = vpow2.f32 %v1252_v23 }
 0x31b   : > { %v1162_v12 = vsub.f32 %v2424_v10, %v1076_v54  ;;  %v1163_v20 = vsub.f32 %v2426_v11, %v1076_v54  ;;  %v1161_v54 = vsub.f32 %v2420_v8, %v1073_v52 }
 0x31c   : > { %v2599_v24 = vpop.eup %1846  ;;  %1378 = vadd.xlane.f32.xlu0 %v1377_v9 }
 0x31d   : > { %v2602_v16 = vpop.eup %1848  ;;  %v1242_v10 = vmul.f32 1.442695, %v1162_v12  ;;  %v1244_v17 = vmul.f32 1.442695, %v1163_v20 }
 0x31e   : > { %v1070_v33 = vpop.xlane.xlu0 %1069  ;;  %v1380_v36 = vadd.f32 %v2602_v16, %v2599_v24 }
 0x31f   : > { %v1158_v23 = vsub.f32 %v2414_v5, %v1070_v33 }
 0x320   : > { %v2607_v35 = vpop.eup %1850  ;;  %1381 = vadd.xlane.f32.xlu0 %v1380_v36 }
 0x321   : > { %v2609_v21 = vpop.eup %1852 }
 0x322   : > { %v2612_v14 = vpop.eup %1854  ;;  %v1067_v18 = vpop.xlane.xlu0 %1066  ;;  %v1383_v15 = vadd.f32 %v2609_v21, %v2607_v35 }
 0x323   : > { %v2617_v45 = vpop.eup %1856  ;;  %v1156_v25 = vsub.f32 %v2410_v3, %v1067_v18  ;;  %v1157_v34 = vsub.f32 %v2412_v4, %v1067_v18  ;;  %v497_v3 = vld [vmem:[%s3013_s6 + $0x8] sm:$0xff]  ;;  %v1160_v4 = vsub.f32 %v2418_v7, %v1073_v52  ;;  %v1159_v18 = vsub.f32 %v2416_v6, %v1070_v33 }
 0x324   : > { %1384 = vadd.xlane.f32.xlu0 %v1383_v15  ;;  %v1374_v27 = vadd.f32 %v2617_v45, %v2612_v14  ;;  %1744 = vmatmul.mubr.msk.f32.gmra.mxu0 %vm340_vm0, %v497_v3  ;;  %v2631_v11 = vpop.eup %1858 }
 0x325   : > { %v1230_v26 = vmul.f32 1.442695, %v1156_v25  ;;  %v1232_v29 = vmul.f32 1.442695, %v1157_v34  ;;  %612 = vmatprep.mubr.f32.mxu0 %v3071_v37  ;;  %v2636_v22 = vpop.eup %1860  ;;  %v1238_v15 = vmul.f32 1.442695, %v1160_v4 }
 0x326   : > { %v1064_v9 = vpop.xlane.xlu0 %1063  ;;  %v1240_v34 = vmul.f32 1.442695, %v1161_v54  ;;  %v1371_v12 = vadd.f32 %v2636_v22, %v2631_v11  ;;  %v1236_v5 = vmul.f32 1.442695, %v1159_v18 }
 0x327   : > { %1866 = vpow2.f32 %v1230_v26  ;;  %v1234_v26 = vmul.f32 1.442695, %v1158_v23  ;;  %v1155_v6 = vsub.f32 %v2408_v2, %v1064_v9 }
 0x328   : > { %1868 = vpow2.f32 %v1232_v29  ;;  %1375 = vadd.xlane.f32.xlu0 %v1374_v27  ;;  %v1110_v29 = vmax.f32 %v2492_v44, %v2496_v46 }
 0x329   : > { %1870 = vpow2.f32 %v1246_v19  ;;  %v1228_v54 = vmul.f32 1.442695, %v1155_v6 }
 0x32a   : > { %1872 = vpow2.f32 %v1248_v13  ;;  %v1061_v36 = vpop.xlane.xlu0 %1060 }
 0x32b   : > { %v1152_v40 = vsub.f32 %v2402_v62, %v1061_v36  ;;  %v1153_v7 = vsub.f32 %v2404_v63, %v1061_v36  ;;  %1874 = vpow2.f32 %v1242_v10  ;;  %v2644_v62 = vpop.eup %1862  ;;  %v1154_v63 = vsub.f32 %v2406_v1, %v1064_v9 }
 0x32c   : > { %1114 = vmax.xlane.f32.xlu0 %v1113_v51  ;;  %1876 = vpow2.f32 %v1244_v17  ;;  %v2650_v52 = vpop.eup %1864 }
 0x32d   : > { %v1222_v8 = vmul.f32 1.442695, %v1152_v40  ;;  %v1224_v25 = vmul.f32 1.442695, %v1153_v7  ;;  %v1226_v1 = vmul.f32 1.442695, %v1154_v63 }
 0x32e   : > { %v1058_v19 = vpop.xlane.xlu0 %1057 }
 0x32f   : > { %1878 = vpow2.f32 %v1222_v8  ;;  %v1150_v2 = vsub.f32 %v2398_v60, %v1058_v19  ;;  %v1151_v17 = vsub.f32 %v2400_v61, %v1058_v19  ;;  %v498_v60 = vld [vmem:[%s3013_s6 + $0x10] sm:$0xff] }
 0x330   : > { %1880 = vpow2.f32 %v1224_v25  ;;  %1372 = vadd.xlane.f32.xlu0 %v1371_v12  ;;  %1745 = vmatmul.mubr.msk.f32.gmra.mxu0 %vm340_vm0, %v498_v60 }
 0x331   : > { %1882 = vpow2.f32 %v1238_v15  ;;  %v1218_v23 = vmul.f32 1.442695, %v1150_v2  ;;  %v1220_v7 = vmul.f32 1.442695, %v1151_v17  ;;  %618 = vmatprep.mubr.f32.mxu0 %v3071_v37 }
 0x332   : > { %1884 = vpow2.f32 %v1240_v34  ;;  %v1055_v33 = vpop.xlane.xlu0 %1054 }
 0x333   : > { %1886 = vpow2.f32 %v1234_v26  ;;  %v1148_v13 = vsub.f32 %v2394_v58, %v1055_v33  ;;  %v1149_v20 = vsub.f32 %v2396_v59, %v1055_v33  ;;  %v1368_v59 = vadd.f32 %v2650_v52, %v2644_v62 }
 0x334   : > { %v2654_v27 = vpop.eup %1866  ;;  %1888 = vpow2.f32 %v1236_v5  ;;  %1111 = vmax.xlane.f32.xlu0 %v1110_v29 }
 0x335   : > { %v2656_v3 = vpop.eup %1868  ;;  %v1214_v9 = vmul.f32 1.442695, %v1148_v13  ;;  %v1216_v4 = vmul.f32 1.442695, %v1149_v20 }
 0x336   : > { %v2659_v10 = vpop.eup %1870  ;;  %v1052_v36 = vpop.xlane.xlu0 %1051  ;;  %v1353_v58 = vadd.f32 %v2656_v3, %v2654_v27 }
 0x337   : > { %v2666_v51 = vpop.eup %1872  ;;  %1890 = vpow2.f32 %v1214_v9  ;;  %v1146_v61 = vsub.f32 %v2390_v56, %v1052_v36  ;;  %v1147_v18 = vsub.f32 %v2392_v57, %v1052_v36  ;;  %v499_v56 = vld [vmem:[%s3013_s6 + $0x18] sm:$0xff] }
 0x338   : > { %1892 = vpow2.f32 %v1216_v4  ;;  %1354 = vadd.xlane.f32.xlu1 %v1353_v58  ;;  %1369 = vadd.xlane.f32.xlu0 %v1368_v59  ;;  %v2673_v40 = vpop.eup %1874  ;;  %v1365_v8 = vadd.f32 %v2666_v51, %v2659_v10 }
 0x339   : > { %1894 = vpow2.f32 %v1226_v1  ;;  %v2679_v25 = vpop.eup %1876  ;;  %v1210_v12 = vmul.f32 1.442695, %v1146_v61  ;;  %1746 = vmatmul.mubr.msk.f32.gmra.mxu0 %vm340_vm0, %v499_v56  ;;  %v1212_v26 = vmul.f32 1.442695, %v1147_v18 }
 0x33a   : > { %1896 = vpow2.f32 %v1228_v54  ;;  %v1130_v15 = vpop.xlane.xlu0 %1129  ;;  %v1362_v63 = vadd.f32 %v2679_v25, %v2673_v40 }
 0x33b   : > { %1898 = vpow2.f32 %v1218_v23  ;;  %v1198_v2 = vsub.f32 %v2534_v42, %v1130_v15  ;;  %v1199_v54 = vsub.f32 %v2536_v43, %v1130_v15 }
 0x33c   : > { %v2684_v34 = vpop.eup %1878  ;;  %1366 = vadd.xlane.f32.xlu0 %v1365_v8  ;;  %1900 = vpow2.f32 %v1220_v7 }
 0x33d   : > { %v2686_v19 = vpop.eup %1880  ;;  %1902 = vpow2.f32 %v1210_v12  ;;  %v1314_v60 = vmul.f32 1.442695, %v1198_v2  ;;  %v1316_v61 = vmul.f32 1.442695, %v1199_v54 }
 0x33e   : > { %v2689_v57 = vpop.eup %1882  ;;  %v2691_v37 = vpop.xlane.xlu0 %1132  ;;  %v1347_v5 = vadd.f32 %v2686_v19, %v2684_v34  ;;  %1904 = vpow2.f32 %v1212_v26 }
 0x33f   : > { %v2697_v6 = vpop.eup %1884  ;;  %1906 = vpow2.f32 %v1314_v60 }
 0x340   : > { %v2699_v33 = vpop.eup %1886  ;;  %1348 = vadd.xlane.f32.xlu1 %v1347_v5  ;;  %1363 = vadd.xlane.f32.xlu0 %v1362_v63  ;;  %v1359_v20 = vadd.f32 %v2697_v6, %v2689_v57  ;;  %1908 = vpow2.f32 %v1316_v61 }
 0x341   : > { %v2701_v29 = vpop.eup %1888 }
 0x342   : > { %v1136_v13 = vpop.xlane.xlu0 %1135  ;;  %v1356_v58 = vadd.f32 %v2701_v29, %v2699_v33 }
 0x343   : > { %v1202_v42 = vsub.f32 %v2546_v53, %v1136_v13  ;;  %v1203_v7 = vsub.f32 %v2548_v55, %v1136_v13 }
 0x344   : > { %v2705_v1 = vpop.eup %1890  ;;  %1360 = vadd.xlane.f32.xlu0 %v1359_v20 }
 0x345   : > { %v2708_v9 = vpop.eup %1892  ;;  %v1322_v12 = vmul.f32 1.442695, %v1202_v42  ;;  %v1324_v55 = vmul.f32 1.442695, %v1203_v7 }
 0x346   : > { %v2710_v4 = vpop.eup %1894  ;;  %v1139_v17 = vpop.xlane.xlu0 %1138  ;;  %v1341_v36 = vadd.f32 %v2708_v9, %v2705_v1 }
 0x347   : > { %v2717_v59 = vpop.eup %1896  ;;  %v1204_v53 = vsub.f32 %v2552_v30, %v1139_v17  ;;  %v1205_v13 = vsub.f32 %v2554_v39, %v1139_v17  ;;  %v1200_v30 = vsub.f32 %v2540_v47, %v2691_v37  ;;  %v1201_v17 = vsub.f32 %v2542_v49, %v2691_v37  ;;  %v3072_v47 = vld [vmem:[#allocation23_spill] sm:$0xff]  ;;  %v3075_v37 = vld [vmem:[#allocation22_spill] sm:$0xff] }
 0x348   : > { %1342 = vadd.xlane.f32.xlu1 %v1341_v36  ;;  %1357 = vadd.xlane.f32.xlu0 %v1356_v58  ;;  %v2720_v23 = vpop.eup %1898  ;;  %v1350_v18 = vadd.f32 %v2717_v59, %v2710_v4 }
 0x349   : > { %v2725_v15 = vpop.eup %1900  ;;  %v1326_v36 = vmul.f32 1.442695, %v1204_v53  ;;  %v1328_v60 = vmul.f32 1.442695, %v1205_v13  ;;  %v1320_v7 = vmul.f32 1.442695, %v1201_v17 }
 0x34a   : > { %v1142_v43 = vpop.xlane.xlu0 %1141  ;;  %v2730_v63 = vpop.eup %1902  ;;  %v1344_v2 = vadd.f32 %v2725_v15, %v2720_v23 }
 0x34b   : > { %v1206_v8 = vsub.f32 %v2558_v0, %v1142_v43  ;;  %v1207_v56 = vsub.f32 %v2560_v32, %v1142_v43  ;;  %v2735_v0 = vpop.eup %1904  ;;  %v3073_v43 = vld [vmem:[#allocation24_spill] sm:$0xff] }
 0x34c   : > { %1351 = vadd.xlane.f32.xlu0 %v1350_v18  ;;  %v2749_v53 = vpop.eup %1906 }
 0x34d   : > { %v1330_v26 = vmul.f32 1.442695, %v1206_v8  ;;  %v1332_v5 = vmul.f32 1.442695, %v1207_v56  ;;  %v3074_v56 = vld [vmem:[#allocation21_spill] sm:$0xff]  ;;  %3076 = vst [vmem:[#allocation23_spill] sm:$0xff] %v2749_v53 }
 0x34e   : > { %v1145_v20 = vpop.xlane.xlu0 %1144 }
 0x34f   : > { %1910 = vpow2.f32 %v1330_v26  ;;  %v1208_v32 = vsub.f32 %v2564_v31, %v1145_v20  ;;  %v1209_v54 = vsub.f32 %v2566_v38, %v1145_v20  ;;  %v1338_v31 = vadd.f32 %v2735_v0, %v2730_v63 }
 0x350   : > { %1912 = vpow2.f32 %v1332_v5  ;;  %1345 = vadd.xlane.f32.xlu0 %v1344_v2  ;;  %v1318_v38 = vmul.f32 1.442695, %v1200_v30  ;;  %v2751_v2 = vpop.eup %1908  ;;  %v3079_v30 = vld [vmem:[#allocation20_spill] sm:$0xff] }
 0x351   : > { %1914 = vpow2.f32 %v1322_v12  ;;  %v1334_v58 = vmul.f32 1.442695, %v1208_v32  ;;  %v1336_v39 = vmul.f32 1.442695, %v1209_v54  ;;  %3077 = vst [vmem:[#allocation24_spill] sm:$0xff] %v2751_v2  ;;  %v3078_v32 = vld [vmem:[#allocation19_spill] sm:$0xff] }
 0x352   : > { %1916 = vpow2.f32 %v1324_v55  ;;  %v1127_v42 = vpop.xlane.xlu0 %1126 }
 0x353   : > { %1918 = vpow2.f32 %v1334_v58  ;;  %v1196_v61 = vsub.f32 %v3072_v47, %v1127_v42  ;;  %v1197_v18 = vsub.f32 %v3073_v43, %v1127_v42  ;;  %v3082_v43 = vld [vmem:[#allocation18_spill] sm:$0xff] }
 0x354   : > { %1920 = vpow2.f32 %v1336_v39  ;;  %1339 = vadd.xlane.f32.xlu0 %v1338_v31 }
 0x355   : > { %1922 = vpow2.f32 %v1326_v36  ;;  %v1310_v26 = vmul.f32 1.442695, %v1196_v61  ;;  %v1312_v13 = vmul.f32 1.442695, %v1197_v18  ;;  %v3081_v61 = vld [vmem:[#allocation17_spill] sm:$0xff] }
 0x356   : > { %1924 = vpow2.f32 %v1328_v60  ;;  %v1124_v8 = vpop.xlane.xlu0 %1123 }
 0x357   : > { %v1194_v49 = vsub.f32 %v3074_v56, %v1124_v8  ;;  %v1195_v12 = vsub.f32 %v3075_v37, %v1124_v8  ;;  %1926 = vpow2.f32 %v1318_v38 }
 0x358   : > { %1928 = vpow2.f32 %v1320_v7 }
 0x359   : > { %v1306_v5 = vmul.f32 1.442695, %v1194_v49  ;;  %v1308_v55 = vmul.f32 1.442695, %v1195_v12 }
 0x35a   : > { %v1121_v20 = vpop.xlane.xlu0 %1120 }
 0x35b   : > { %1930 = vpow2.f32 %v1306_v5  ;;  %v1192_v54 = vsub.f32 %v3078_v32, %v1121_v20  ;;  %v1193_v36 = vsub.f32 %v3079_v30, %v1121_v20  ;;  %v1416_v32 = vadd.f32 %v2751_v2, %v2749_v53 }
 0x35c   : > { %v2755_v58 = vpop.eup %1910  ;;  %1932 = vpow2.f32 %v1308_v55 }
 0x35d   : > { %v2757_v39 = vpop.eup %1912  ;;  %1934 = vpow2.f32 %v1310_v26  ;;  %v1302_v17 = vmul.f32 1.442695, %v1192_v54  ;;  %v1304_v42 = vmul.f32 1.442695, %v1193_v36 }
 0x35e   : > { %v2759_v60 = vpop.eup %1914  ;;  %1936 = vpow2.f32 %v1312_v13  ;;  %v1118_v31 = vpop.xlane.xlu0 %1117  ;;  %v1428_v38 = vadd.f32 %v2757_v39, %v2755_v58 }
 0x35f   : > { %3080 = vst [vmem:[#allocation21_spill] sm:$0xff] %v2759_v60  ;;  %v2763_v47 = vpop.eup %1916  ;;  %v1190_v7 = vsub.f32 %v3081_v61, %v1118_v31  ;;  %v1191_v18 = vsub.f32 %v3082_v43, %v1118_v31  ;;  %1938 = vpow2.f32 %v1302_v17 }
 0x360   : > { %v2767_v8 = vpop.eup %1918  ;;  %1429 = vadd.xlane.f32.xlu0 %v1428_v38  ;;  %1940 = vpow2.f32 %v1304_v42  ;;  %v1422_v5 = vadd.f32 %v2763_v47, %v2759_v60 }
 0x361   : > { %v2769_v56 = vpop.eup %1920  ;;  %v1298_v49 = vmul.f32 1.442695, %v1190_v7  ;;  %v1300_v37 = vmul.f32 1.442695, %v1191_v18 }
 0x362   : > { %v2771_v12 = vpop.eup %1922  ;;  %v1431_v26 = vadd.f32 %v2769_v56, %v2767_v8 }
 0x363   : > { %v2777_v55 = vpop.eup %1924  ;;  %1942 = vpow2.f32 %v1298_v49 }
 0x364   : > { %1944 = vpow2.f32 %v1300_v37  ;;  %1432 = vadd.xlane.f32.xlu1 %v1431_v26  ;;  %1423 = vadd.xlane.f32.xlu0 %v1422_v5  ;;  %v2779_v13 = vpop.eup %1926  ;;  %v1425_v20 = vadd.f32 %v2777_v55, %v2771_v12 }
 0x365   : > { %3083 = vst [vmem:[#allocation22_spill] sm:$0xff] %v2779_v13  ;;  %v2785_v54 = vpop.eup %1928 }
 0x366   : > { %3084 = vst [vmem:[#allocation19_spill] sm:$0xff] %v2785_v54  ;;  %v1419_v42 = vadd.f32 %v2785_v54, %v2779_v13  ;;  %v3097_v54 = vld [vmem:[#allocation12_spill] sm:$0xff] }
 0x368   : > { %v2787_v30 = vpop.eup %1930  ;;  %1426 = vadd.xlane.f32.xlu1 %v1425_v20  ;;  %1417 = vadd.xlane.f32.xlu0 %v1416_v32  ;;  %v1109_v20 = vpop.xlane.xlu1 %1108 }
 0x369   : > { %3085 = vst [vmem:[#allocation20_spill] sm:$0xff] %v2787_v30  ;;  %v2789_v36 = vpop.eup %1932 }
 0x36a   : > { %3086 = vst [vmem:[#allocation17_spill] sm:$0xff] %v2789_v36  ;;  %v2791_v17 = vpop.eup %1934  ;;  %v1410_v31 = vadd.f32 %v2789_v36, %v2787_v30  ;;  %v3093_v30 = vld [vmem:[#allocation15_spill] sm:$0xff] }
 0x36b   : > { %3087 = vst [vmem:[#allocation18_spill] sm:$0xff] %v2791_v17  ;;  %v2797_v38 = vpop.eup %1936  ;;  %v1184_v36 = vsub.f32 %v3093_v30, %v1109_v20 }
 0x36c   : > { %3088 = vst [vmem:[#allocation25_spill] sm:$0xff] %v2797_v38  ;;  %1420 = vadd.xlane.f32.xlu1 %v1419_v42  ;;  %1411 = vadd.xlane.f32.xlu0 %v1410_v31  ;;  %v2799_v61 = vpop.eup %1938  ;;  %v1413_v7 = vadd.f32 %v2797_v38, %v2791_v17  ;;  %v1106_v31 = vpop.xlane.xlu1 %1105  ;;  %v3094_v17 = vld [vmem:[#allocation16_spill] sm:$0xff] }
 0x36d   : > { %3089 = vst [vmem:[#allocation26_spill] sm:$0xff] %v2799_v61  ;;  %v2803_v43 = vpop.eup %1940  ;;  %v1185_v38 = vsub.f32 %v3094_v17, %v1109_v20  ;;  %v1286_v53 = vmul.f32 1.442695, %v1184_v36 }
 0x36e   : > { %3090 = vst [vmem:[#allocation27_spill] sm:$0xff] %v2803_v43  ;;  %v1407_v37 = vadd.f32 %v2803_v43, %v2799_v61 }
 0x36f   : > { %v1288_v30 = vmul.f32 1.442695, %v1185_v38 }
 0x370   : > { %v2805_v18 = vpop.eup %1942  ;;  %1414 = vadd.xlane.f32.xlu1 %v1413_v7  ;;  %v1103_v61 = vpop.xlane.xlu1 %1102 }
 0x371   : > { %3091 = vst [vmem:[#allocation28_spill] sm:$0xff] %v2805_v18  ;;  %v2807_v49 = vpop.eup %1944 }
 0x372   : > { %3092 = vst [vmem:[#allocation29_spill] sm:$0xff] %v2807_v49  ;;  %v1404_v26 = vadd.f32 %v2807_v49, %v2805_v18  ;;  %v3095_v18 = vld [vmem:[#allocation13_spill] sm:$0xff] }
 0x373   : > { %v1182_v49 = vsub.f32 %v3095_v18, %v1106_v31 }
 0x374   : > { %1408 = vadd.xlane.f32.xlu1 %v1407_v37  ;;  %1405 = vadd.xlane.f32.xlu0 %v1404_v26 }
 0x375   : > { %v1282_v20 = vmul.f32 1.442695, %v1182_v49 }
 0x3a5   : > { %v1379_v5 = vpop.xlane.xlu0 %1378 }
 0x3a9   : > { %v1382_v32 = vpop.xlane.xlu0 %1381 }
 0x3aa   : > { %1946 = vrcp.f32 %v1382_v32  ;;  %v3096_v32 = vld [vmem:[#allocation11_spill] sm:$0xff] }
 0x3ab   : > { %v1180_v2 = vsub.f32 %v3096_v32, %v1103_v61 }
 0x3ad   : > { %v1385_v42 = vpop.xlane.xlu0 %1384 }
 0x3ae   : > { %1948 = vrcp.f32 %v1385_v42 }
 0x3af   : > { %1950 = vrcp.f32 %v1379_v5  ;;  %v1181_v5 = vsub.f32 %v3097_v54, %v1103_v61 }
 0x3b1   : > { %v1376_v7 = vpop.xlane.xlu0 %1375 }
 0x3b2   : > { %1952 = vrcp.f32 %v1376_v7  ;;  %v1278_v7 = vmul.f32 1.442695, %v1180_v2 }
 0x3b3   : > { %1954 = vpow2.f32 %v1286_v53  ;;  %v1100_v53 = vpop.xlane.xlu1 %1099 }
 0x3b5   : > { %v1115_v43 = vpop.xlane.xlu0 %1114 }
 0x3b6   : > { %v1188_v37 = vsub.f32 %v2500_v48, %v1115_v43  ;;  %v1189_v26 = vsub.f32 %v2504_v50, %v1115_v43  ;;  %v3098_v43 = vld [vmem:[#allocation14_spill] sm:$0xff] }
 0x3b7   : > { %v1947_v17 = vpop.eup %1946  ;;  %v1183_v18 = vsub.f32 %v3098_v43, %v1106_v31 }
 0x3b8   : > { %v1294_v42 = vmul.f32 1.442695, %v1188_v37  ;;  %v1296_v13 = vmul.f32 1.442695, %v1189_v26  ;;  %v1280_v37 = vmul.f32 1.442695, %v1181_v5  ;;  %v1495_v49 = vmul.f32 %v1947_v17, %v2602_v16 }
 0x3b9   : > { %v1373_v60 = vpop.xlane.xlu0 %1372  ;;  %v1284_v31 = vmul.f32 1.442695, %v1183_v18  ;;  %v3100_v26 = vld [vmem:[#allocation10_spill] sm:$0xff] }
 0x3ba   : > { %1956 = vpow2.f32 %v1294_v42  ;;  %v1179_v32 = vsub.f32 %v3100_v26, %v1100_v53 }
 0x3bb   : > { %v1949_v36 = vpop.eup %1948  ;;  %1958 = vpow2.f32 %v1296_v13 }
 0x3bc   : > { %1960 = vrcp.f32 %v1373_v60  ;;  %v1497_v48 = vmul.f32 %v1949_v36, %v2609_v21  ;;  %v1496_v50 = vmul.f32 %v1949_v36, %v2607_v35  ;;  %v1951_v13 = vpop.eup %1950  ;;  %v3099_v21 = vld [vmem:[#allocation9_spill] sm:$0xff]  ;;  %v1276_v5 = vmul.f32 1.442695, %v1179_v32 }
 0x3bd   : > { %1962 = vpow2.f32 %v1288_v30  ;;  %v1112_v38 = vpop.xlane.xlu0 %1111  ;;  %v1178_v2 = vsub.f32 %v3099_v21, %v1100_v53 }
 0x3be   : > { %v1186_v54 = vsub.f32 %v2492_v44, %v1112_v38  ;;  %v1187_v61 = vsub.f32 %v2496_v46, %v1112_v38  ;;  %1530 = vmatprep.subr.mxu1 %v1497_v48  ;;  %1964 = vpow2.f32 %v1282_v20  ;;  %v1494_v44 = vmul.f32 %v1947_v17, %v2599_v24 }
 0x3bf   : > { %1531 = vmatpush1.xpose.msra.mxu1 %v1496_v50  ;;  %1966 = vpow2.f32 %v1278_v7  ;;  %v1493_v46 = vmul.f32 %v1951_v13, %v2595_v28  ;;  %v1953_v16 = vpop.eup %1952  ;;  %v1274_v30 = vmul.f32 1.442695, %v1178_v2  ;;  %v1492_v20 = vmul.f32 %v1951_v13, %v2593_v41 }
 0x3c0   : > { %v1290_v35 = vmul.f32 1.442695, %v1186_v54  ;;  %v1292_v60 = vmul.f32 1.442695, %v1187_v61  ;;  %1532 = vmatprep.subr.mxu1 %v1495_v49  ;;  %1968 = vpow2.f32 %v1280_v37  ;;  %v2831_v7 = vpop.eup %1954  ;;  %v1491_v48 = vmul.f32 %v1953_v16, %v2617_v45 }
 0x3c1   : > { %v1370_v42 = vpop.xlane.xlu0 %1369  ;;  %v1490_v41 = vmul.f32 %v1953_v16, %v2612_v14  ;;  %v1355_v21 = vpop.xlane.xlu1 %1354 }
 0x3c2   : > { %1970 = vpow2.f32 %v1290_v35 }
 0x3c3   : > { %1972 = vpow2.f32 %v1292_v60  ;;  %1533 = vmatpush1.xpose.msra.mxu1 %v1494_v44 }
 0x3c4   : > { %1974 = vrcp.f32 %v1370_v42  ;;  %1534 = vmatprep.subr.mxu1 %v1493_v46 }
 0x3c5   : > { %1976 = vpow2.f32 %v1284_v31  ;;  %v1367_v36 = vpop.xlane.xlu0 %1366 }
 0x3c6   : > { %1978 = vrcp.f32 %v1367_v36 }
 0x3c7   : > { %v2834_v24 = vpop.eup %1956  ;;  %1535 = vmatpush1.xpose.msra.mxu1 %v1492_v20  ;;  %1980 = vpow2.f32 %v1274_v30 }
 0x3c8   : > { %v2836_v28 = vpop.eup %1958  ;;  %1536 = vmatprep.subr.mxu1 %v1491_v48  ;;  %1982 = vpow2.f32 %v1276_v5 }
 0x3c9   : > { %v1961_v17 = vpop.eup %1960  ;;  %v1364_v50 = vpop.xlane.xlu0 %1363  ;;  %v1401_v43 = vadd.f32 %v2836_v28, %v2834_v24 }
 0x3ca   : > { %v2841_v18 = vpop.eup %1962  ;;  %1984 = vrcp.f32 %v1364_v50  ;;  %v1489_v45 = vmul.f32 %v1961_v17, %v2636_v22  ;;  %v1488_v61 = vmul.f32 %v1961_v17, %v2631_v11  ;;  %v1349_v36 = vpop.xlane.xlu1 %1348 }
 0x3cb   : > { %1402 = vadd.xlane.f32.xlu1 %v1401_v43  ;;  %1537 = vmatpush1.xpose.msra.mxu1 %v1490_v41  ;;  %v2844_v37 = vpop.eup %1964  ;;  %v1395_v54 = vadd.f32 %v2841_v18, %v2831_v7 }
 0x3cc   : > { %1538 = vmatprep.subr.mxu1 %v1489_v45  ;;  %v2846_v53 = vpop.eup %1966 }
 0x3cd   : > { %v1361_v38 = vpop.xlane.xlu0 %1360  ;;  %v2851_v49 = vpop.eup %1968 }
 0x3ce   : > { %1986 = vrcp.f32 %v1361_v38  ;;  %v1389_v60 = vadd.f32 %v2851_v49, %v2846_v53  ;;  %v500_v38 = vld [vmem:[%s3014_s7] sm:$0xff] }
 0x3cf   : > { %v2853_v14 = vpop.eup %1970  ;;  %1396 = vadd.xlane.f32.xlu1 %v1395_v54  ;;  %1539 = vmatpush1.xpose.msra.mxu1 %v1488_v61 }
 0x3d0   : > { %v2855_v22 = vpop.eup %1972 }
 0x3d1   : > { %v1975_v13 = vpop.eup %1974  ;;  %v1358_v2 = vpop.xlane.xlu0 %1357  ;;  %v1398_v35 = vadd.f32 %v2855_v22, %v2853_v14 }
 0x3d2   : > { %v2861_v31 = vpop.eup %1976  ;;  %1988 = vrcp.f32 %v1358_v2  ;;  %v1487_v11 = vmul.f32 %v1975_v13, %v2650_v52  ;;  %v1486_v26 = vmul.f32 %v1975_v13, %v2644_v62  ;;  %v1343_v45 = vpop.xlane.xlu1 %1342 }
 0x3d3   : > { %v1979_v32 = vpop.eup %1978  ;;  %1399 = vadd.xlane.f32.xlu0 %v1398_v35  ;;  %1390 = vadd.xlane.f32.xlu1 %v1389_v60  ;;  %1990 = vrcp.f32 %v1355_v21  ;;  %v1392_v16 = vadd.f32 %v2861_v31, %v2844_v37 }
 0x3d4   : > { %1540 = vmatprep.subr.mxu1 %v1487_v11  ;;  %v1485_v42 = vmul.f32 %v1979_v32, %v2666_v51  ;;  %v2866_v44 = vpop.eup %1980  ;;  %v1484_v30 = vmul.f32 %v1979_v32, %v2659_v10 }
 0x3d5   : > { %1541 = vmatpush1.xpose.msra.mxu1 %v1486_v26  ;;  %v1352_v46 = vpop.xlane.xlu0 %1351  ;;  %v2871_v5 = vpop.eup %1982 }
 0x3d6   : > { %1542 = vmatprep.subr.mxu1 %v1485_v42  ;;  %1992 = vrcp.f32 %v1352_v46  ;;  %v1386_v51 = vadd.f32 %v2871_v5, %v2866_v44 }
 0x3d7   : > { %v1985_v62 = vpop.eup %1984  ;;  %1393 = vadd.xlane.f32.xlu0 %v1392_v16  ;;  %1994 = vrcp.f32 %v1349_v36 }
 0x3d8   : > { %v1483_v52 = vmul.f32 %v1985_v62, %v2679_v25  ;;  %v1482_v20 = vmul.f32 %v1985_v62, %v2673_v40 }
 0x3d9   : > { %1543 = vmatpush1.xpose.msra.mxu1 %v1484_v30  ;;  %v1346_v17 = vpop.xlane.xlu0 %1345 }
 0x3da   : > { %1544 = vmatprep.subr.mxu1 %v1483_v52  ;;  %1996 = vrcp.f32 %v1346_v17 }
 0x3db   : > { %v1987_v48 = vpop.eup %1986  ;;  %1387 = vadd.xlane.f32.xlu0 %v1386_v51  ;;  %1998 = vrcp.f32 %v1343_v45 }
 0x3dc   : > { %v1481_v10 = vmul.f32 %v1987_v48, %v2697_v6  ;;  %v1480_v50 = vmul.f32 %v1987_v48, %v2689_v57 }
 0x3dd   : > { %1545 = vmatpush1.xpose.msra.mxu1 %v1482_v20  ;;  %v1340_v54 = vpop.xlane.xlu0 %1339 }
 0x3de   : > { %1546 = vmatprep.subr.mxu1 %v1481_v10  ;;  %2000 = vrcp.f32 %v1340_v54 }
 0x3df   : > { %v1989_v43 = vpop.eup %1988 }
 0x3e0   : > { %v1479_v25 = vmul.f32 %v1989_v43, %v2701_v29  ;;  %v1991_v41 = vpop.eup %1990  ;;  %v1478_v40 = vmul.f32 %v1989_v43, %v2699_v33  ;;  %v502_v29 = vld [vmem:[%s3014_s7 + $0x10] sm:$0xff]  ;;  %v3101_v43 = vld [vmem:[#allocation21_spill] sm:$0xff] }
 0x3e1   : > { %1547 = vmatpush1.xpose.msra.mxu1 %v1480_v50  ;;  %v1477_v6 = vmul.f32 %v1991_v41, %v2656_v3  ;;  %v1476_v61 = vmul.f32 %v1991_v41, %v2654_v27  ;;  %v503_v3 = vld [vmem:[%s3014_s7 + $0x18] sm:$0xff] }
 0x3e2   : > { %1548 = vmatprep.subr.mxu1 %v1479_v25 }
 0x3e3   : > { %v1993_v57 = vpop.eup %1992 }
 0x3e4   : > { %506 = vperm.xlu1 %1841, %v500_v38   ;;  %v1475_v33 = vmul.f32 %v1993_v57, %v2717_v59  ;;  %v1995_v13 = vpop.eup %1994  ;;  %v1474_v21 = vmul.f32 %v1993_v57, %v2710_v4  ;;  %v501_v59 = vld [vmem:[%s3014_s7 + $0x8] sm:$0xff] }
 0x3e5   : > { %1549 = vmatpush1.xpose.msra.mxu1 %v1478_v40  ;;  %v1473_v2 = vmul.f32 %v1995_v13, %v2686_v19  ;;  %v1472_v11 = vmul.f32 %v1995_v13, %v2684_v34  ;;  %v3103_v40 = vld [vmem:[#allocation22_spill] sm:$0xff] }
 0x3e6   : > { %1550 = vmatprep.subr.mxu1 %v1477_v6  ;;  %v3107_v13 = vld [vmem:[#allocation18_spill] sm:$0xff] }
 0x3e7   : > { %v1997_v35 = vpop.eup %1996 }
 0x3e8   : > { %516 = vperm.xlu1 %1841, %v502_v29   ;;  %v1471_v26 = vmul.f32 %v1997_v35, %v2725_v15  ;;  %v1999_v32 = vpop.eup %1998  ;;  %v1470_v4 = vmul.f32 %v1997_v35, %v2720_v23  ;;  %v3106_v29 = vld [vmem:[#allocation25_spill] sm:$0xff] }
 0x3e9   : > { %1551 = vmatpush1.xpose.msra.mxu1 %v1476_v61  ;;  %v1430_v60 = vpop.xlane.xlu0 %1429  ;;  %v1469_v42 = vmul.f32 %v1999_v32, %v2708_v9  ;;  %v1468_v30 = vmul.f32 %v1999_v32, %v2705_v1  ;;  %v3111_v32 = vld [vmem:[#allocation26_spill] sm:$0xff] }
 0x3ea   : > { %1552 = vmatprep.subr.mxu1 %v1475_v33 }
 0x3eb   : > { %v2001_v46 = vpop.eup %2000 }
 0x3ec   : > { %521 = vperm.xlu1 %1841, %v503_v3   ;;  %v1467_v34 = vmul.f32 %v2001_v46, %v2735_v0  ;;  %v1466_v62 = vmul.f32 %v2001_v46, %v2730_v63  ;;  %v3113_v46 = vld [vmem:[#allocation28_spill] sm:$0xff] }
 0x3ed   : > { %1553 = vmatpush1.xpose.msra.mxu1 %v1474_v21  ;;  %v1433_v27 = vpop.xlane.xlu1 %1432  ;;  %v1424_v16 = vpop.xlane.xlu0 %1423  ;;  %v3108_v21 = vld [vmem:[#allocation17_spill] sm:$0xff] }
 0x3ee   : > { %1554 = vmatprep.subr.mxu1 %v1473_v2  ;;  %2002 = vrcp.f32 %v1433_v27 }
 0x3ef   : > { %2004 = vrcp.f32 %v1430_v60  ;;  %v3109_v60 = vld [vmem:[#allocation20_spill] sm:$0xff] }
 0x3f1   : > { %1555 = vmatpush1.xpose.msra.mxu1 %v1472_v11  ;;  %511 = vperm.xlu0 %1840, %v501_v59   ;;  %v1427_v19 = vpop.xlane.xlu1 %1426  ;;  %v1418_v36 = vpop.xlane.xlu0 %1417  ;;  %v3110_v59 = vld [vmem:[#allocation27_spill] sm:$0xff] }
 0x3f2   : > { %1556 = vmatprep.subr.mxu1 %v1471_v26  ;;  %2006 = vrcp.f32 %v1427_v19 }
 0x3f3   : > { %2008 = vrcp.f32 %v1424_v16 }
 0x3f5   : > { %1557 = vmatpush1.xpose.msra.mxu1 %v1470_v4  ;;  %v1421_v15 = vpop.xlane.xlu1 %1420  ;;  %v1412_v17 = vpop.xlane.xlu0 %1411  ;;  %v3112_v4 = vld [vmem:[#allocation29_spill] sm:$0xff] }
 0x3f6   : > { %1558 = vmatprep.subr.mxu1 %v1469_v42  ;;  %2010 = vrcp.f32 %v1421_v15  ;;  %v602_v15 = vpop.f32.mrf.mxu0 }
 0x3f7   : > { %2012 = vrcp.f32 %v1418_v36 }
 0x3f9   : > { %1559 = vmatpush1.xpose.msra.mxu1 %v1468_v30  ;;  %v1415_v0 = vpop.xlane.xlu1 %1414 }
 0x3fa   : > { %1560 = vmatprep.subr.mxu1 %v1467_v34  ;;  %2014 = vrcp.f32 %v1415_v0 }
 0x3fb   : > { %v2003_v52 = vpop.eup %2002  ;;  %2016 = vrcp.f32 %v1412_v17 }
 0x3fc   : > { %v2005_v23 = vpop.eup %2004  ;;  %v1529_v9 = vmul.f32 %v2003_v52, %v2769_v56  ;;  %v1528_v51 = vmul.f32 %v2003_v52, %v2767_v8 }
 0x3fd   : > { %1561 = vmatpush1.xpose.msra.mxu1 %v1466_v62  ;;  %v1527_v1 = vmul.f32 %v2005_v23, %v2757_v39  ;;  %v1526_v48 = vmul.f32 %v2005_v23, %v2755_v58  ;;  %v1409_v39 = vpop.xlane.xlu1 %1408  ;;  %v3102_v58 = vld [vmem:[#allocation19_spill] sm:$0xff]  ;;  %v604_v23 = vpop.f32.mrf.mxu0 }
 0x3fe   : > { %1562 = vmatprep.subr.mxu1 %v1529_v9  ;;  %2018 = vrcp.f32 %v1409_v39 }
 0x3ff   : > { %v2007_v20 = vpop.eup %2006 }
 0x400   : > { %v1525_v63 = vmul.f32 %v2007_v20, %v2777_v55  ;;  %v2009_v10 = vpop.eup %2008  ;;  %v1524_v56 = vmul.f32 %v2007_v20, %v2771_v12  ;;  %v1406_v55 = vpop.xlane.xlu0 %1405  ;;  %v3104_v12 = vld [vmem:[#allocation24_spill] sm:$0xff] }
 0x401   : > { %1563 = vmatpush2.xpose.msra.mxu1 %v1528_v51  ;;  %v1523_v8 = vmul.f32 %v2009_v10, %v2763_v47  ;;  %v1522_v25 = vmul.f32 %v2009_v10, %v3101_v43  ;;  %2020 = vrcp.f32 %v1406_v55  ;;  %v3105_v47 = vld [vmem:[#allocation23_spill] sm:$0xff]  ;;  %v608_v43 = vpop.f32.mrf.mxu0 }
 0x402   : > { %1564 = vmatprep.subr.mxu1 %v1527_v1 }
 0x403   : > { %v2011_v50 = vpop.eup %2010 }
 0x404   : > { %v1521_v41 = vmul.f32 %v2011_v50, %v3102_v58  ;;  %v2013_v45 = vpop.eup %2012  ;;  %v1520_v38 = vmul.f32 %v2011_v50, %v3103_v40 }
 0x405   : > { %1565 = vmatpush2.xpose.msra.mxu1 %v1526_v48  ;;  %v1519_v6 = vmul.f32 %v2013_v45, %v3104_v12  ;;  %v1518_v54 = vmul.f32 %v2013_v45, %v3105_v47 }
 0x406   : > { %1566 = vmatprep.subr.mxu1 %v1525_v63 }
 0x407   : > { %v2015_v57 = vpop.eup %2014 }
 0x408   : > { %v1517_v61 = vmul.f32 %v2015_v57, %v3106_v29  ;;  %v2017_v33 = vpop.eup %2016  ;;  %v1516_v3 = vmul.f32 %v2015_v57, %v3107_v13  ;;  %v2034_v13 = vld [vmem:[%s2295_s20] sm:$0xff] }
 0x409   : > { %1567 = vmatpush2.xpose.msra.mxu1 %v1524_v56  ;;  %v1515_v2 = vmul.f32 %v2017_v33, %v3108_v21  ;;  %v1514_v27 = vmul.f32 %v2017_v33, %v3109_v60 }
 0x40a   : > { %1568 = vmatprep.subr.mxu1 %v1523_v8 }
 0x40b   : > { %v2019_v35 = vpop.eup %2018 }
 0x40c   : > { %v1513_v11 = vmul.f32 %v2019_v35, %v3110_v59  ;;  %v1512_v19 = vmul.f32 %v2019_v35, %v3111_v32  ;;  %v2035_v35 = vld [vmem:[%s2295_s20 + $0x8] sm:$0xff] }
 0x40d   : > { %1569 = vmatpush2.xpose.msra.mxu1 %v1522_v25 }
 0x40e   : > { %1570 = vmatprep.subr.mxu1 %v1521_v41  ;;  %v2021_v26 = vpop.eup %2020 }
 0x40f   : > { %v1511_v42 = vmul.f32 %v2021_v26, %v3112_v4  ;;  %v1510_v16 = vmul.f32 %v2021_v26, %v3113_v46  ;;  %v2037_v4 = vld [vmem:[%s2295_s20 + $0x18] sm:$0xff] }
 0x411   : > { %1571 = vmatpush2.xpose.msra.mxu1 %v1520_v38 }
 0x412   : > { %1572 = vmatprep.subr.mxu1 %v1519_v6 }
 0x415   : > { %1573 = vmatpush2.xpose.msra.mxu1 %v1518_v54  ;;  %v1620_v54 = vstv %s1619_s27 }
 0x416   : > { %1574 = vmatprep.subr.mxu1 %v1517_v61 }
 0x419   : > { %1575 = vmatpush2.xpose.msra.mxu1 %v1516_v3 }
 0x41a   : > { %1576 = vmatprep.subr.mxu1 %v1515_v2 }
 0x41d   : > { %1577 = vmatpush2.xpose.msra.mxu1 %v1514_v27 }
 0x41e   : > { %1578 = vmatprep.subr.mxu1 %v1513_v11  ;;  %v2036_v11 = vld [vmem:[%s2295_s20 + $0x10] sm:$0xff] }
 0x421   : > { %1579 = vmatpush2.xpose.msra.mxu1 %v1512_v19 }
 0x422   : > { %1580 = vmatprep.subr.mxu1 %v1511_v42 }
 0x425   : > { %1581 = vmatpush2.xpose.msra.mxu1 %v1510_v16 }
 0x454   : > { %v1403_v30 = vpop.xlane.xlu1 %1402 }
 0x455   : > { %2022 = vrcp.f32 %v1403_v30  ;;  %v2038_v30 = vld [vmem:[%s2295_s20 + $0x20] sm:$0xff] }
 0x458   : > { %v1397_v34 = vpop.xlane.xlu1 %1396 }
 0x459   : > { %2024 = vrcp.f32 %v1397_v34 }
 0x45c   : > { %v1400_v62 = vpop.xlane.xlu0 %1399  ;;  %v1391_v52 = vpop.xlane.xlu1 %1390 }
 0x45d   : > { %2026 = vrcp.f32 %v1400_v62 }
 0x460   : > { %v1394_v36 = vpop.xlane.xlu0 %1393  ;;  %v507_v9 = vpop.permute.xlu1 %506 }
 0x461   : > { %2028 = vrcp.f32 %v1394_v36  ;;  %v605_v51 = vadd.f32 %v604_v23, %v507_v9  ;;  %v603_v40 = vadd.f32 %v602_v15, %v507_v9 }
 0x462   : > { %v2023_v1 = vpop.eup %2022  ;;  %2030 = vrcp.f32 %v1391_v52  ;;  %v2039_v52 = vld [vmem:[%s2295_s20 + $0x28] sm:$0xff] }
 0x463   : > { %v1509_v20 = vmul.f32 %v2023_v1, %v2836_v28  ;;  %v1508_v0 = vmul.f32 %v2023_v1, %v2834_v24  ;;  %1594 = vmatprep.mubr.f32.mxu1 %v605_v51  ;;  %v2040_v51 = vld [vmem:[%s2295_s20 + $0x30] sm:$0xff] }
 0x464   : > { %v1388_v48 = vpop.xlane.xlu0 %1387 }
 0x465   : > { %1582 = vmatprep.subr.mxu1 %v1509_v20  ;;  %2032 = vrcp.f32 %v1388_v48 }
 0x466   : > { %1583 = vmatpush2.xpose.msra.mxu1 %v1508_v0  ;;  %v2025_v63 = vpop.eup %2024  ;;  %v2041_v0 = vld [vmem:[%s2295_s20 + $0x38] sm:$0xff] }
 0x467   : > { %v1505_v8 = vmul.f32 %v2025_v63, %v2841_v18  ;;  %v1504_v24 = vmul.f32 %v2025_v63, %v2831_v7 }
 0x46a   : > { %v2027_v10 = vpop.eup %2026 }
 0x46b   : > { %v1507_v17 = vmul.f32 %v2027_v10, %v2855_v22  ;;  %v1506_v56 = vmul.f32 %v2027_v10, %v2853_v14  ;;  %v610_v14 = vpop.f32.mrf.mxu0 }
 0x46d   : > { %1584 = vmatprep.subr.mxu1 %v1507_v17  ;;  %v614_v41 = vpop.f32.mrf.mxu0 }
 0x46e   : > { %v2029_v50 = vpop.eup %2028  ;;  %1585 = vmatpush2.xpose.msra.mxu1 %v1506_v56 }
 0x46f   : > { %1586 = vmatprep.subr.mxu1 %v1505_v8  ;;  %v1503_v28 = vmul.f32 %v2029_v50, %v2861_v31  ;;  %v2031_v39 = vpop.eup %2030  ;;  %v1502_v25 = vmul.f32 %v2029_v50, %v2844_v37  ;;  %v512_v31 = vpop.permute.xlu0 %511 }
 0x470   : > { %v1501_v22 = vmul.f32 %v2031_v39, %v2851_v49  ;;  %v1500_v18 = vmul.f32 %v2031_v39, %v2846_v53  ;;  %v616_v55 = vpop.f32.mrf.mxu0  ;;  %v517_v37 = vpop.permute.xlu1 %516  ;;  %v611_v38 = vadd.f32 %v610_v14, %v512_v31  ;;  %v609_v12 = vadd.f32 %v608_v43, %v512_v31 }
 0x471   : > { %v617_v6 = vadd.f32 %v616_v55, %v517_v37 }
 0x472   : > { %1587 = vmatpush2.xpose.msra.mxu1 %v1504_v24  ;;  %v2033_v58 = vpop.eup %2032  ;;  %v620_v49 = vpop.f32.mrf.mxu0 }
 0x473   : > { %1588 = vmatprep.subr.mxu1 %v1503_v28  ;;  %v1499_v45 = vmul.f32 %v2033_v58, %v2871_v5  ;;  %v1498_v7 = vmul.f32 %v2033_v58, %v2866_v44  ;;  %v615_v5 = vadd.f32 %v614_v41, %v517_v37 }
 0x474   : > { %v622_v53 = vpop.f32.mrf.mxu0  ;;  %v522_v57 = vpop.permute.xlu1 %521 }
 0x475   : > { %v623_v47 = vadd.f32 %v622_v53, %v522_v57  ;;  %v621_v44 = vadd.f32 %v620_v49, %v522_v57 }
 0x476   : > { %1589 = vmatpush2.xpose.msra.mxu1 %v1502_v25 }
 0x477   : > { %1590 = vmatprep.subr.mxu1 %v1501_v22 }
 0x47a   : > { %1591 = vmatpush2.xpose.msra.mxu1 %v1500_v18 }
 0x47b   : > { %1592 = vmatprep.subr.mxu1 %v1499_v45 }
 0x47e   : > { %1593 = vmatpush2.xpose.msra.mxu1 %v1498_v7 }
 0x481   : > { %1595 = vmatmul.mubr.f32.vlgmr.msra.gmra.mxu1 %v603_v40 }
 0x482   : > { %1600 = vmatprep.mubr.f32.mxu1 %v611_v38 }
 0x485   : > { %1601 = vmatmul.mubr.f32.gmra.mxu1 %v609_v12 }
 0x486   : > { %1606 = vmatprep.mubr.f32.mxu1 %v617_v6 }
 0x489   : > { %1607 = vmatmul.mubr.f32.gmra.mxu1 %v615_v5 }
 0x48a   : > { %1612 = vmatprep.mubr.f32.mxu1 %v623_v47 }
 0x48d   : > { %1613 = vmatmul.mubr.f32.gmra.mxu1 %v621_v44 }
 0x541   : > { %v1596_v29 = vpop.f32.mrf.mxu1 }
 0x542   : > { %v1621_v61 = vmul.f32 %v1620_v54, %v1596_v29 }
 0x543   : > { %v1598_v33 = vpop.f32.mrf.mxu1 }
 0x544   : > { %v1629_v3 = vadd.f32 %v2034_v13, %v1621_v61  ;;  %v1622_v21 = vmul.f32 %v1620_v54, %v1598_v33 }
 0x545   : > { %v1602_v2 = vpop.f32.mrf.mxu1 }
 0x546   : > { %1637 = vst [vmem:[%s2940_s28] sm:$0xff] %v1629_v3  ;;  %v1630_v60 = vadd.f32 %v2035_v35, %v1622_v21  ;;  %v1623_v27 = vmul.f32 %v1620_v54, %v1602_v2 }
 0x547   : > { %v1604_v59 = vpop.f32.mrf.mxu1 }
 0x548   : > { %1638 = vst [vmem:[%s2940_s28 + $0x8] sm:$0xff] %v1630_v60  ;;  %v1631_v26 = vadd.f32 %v2036_v11, %v1623_v27  ;;  %v1624_v32 = vmul.f32 %v1620_v54, %v1604_v59 }
 0x549   : > { %v1608_v19 = vpop.f32.mrf.mxu1 }
 0x54a   : > { %1639 = vst [vmem:[%s2940_s28 + $0x10] sm:$0xff] %v1631_v26  ;;  %v1632_v42 = vadd.f32 %v2037_v4, %v1624_v32  ;;  %v1625_v46 = vmul.f32 %v1620_v54, %v1608_v19 }
 0x54b   : > { %v1610_v16 = vpop.f32.mrf.mxu1 }
 0x54c   : > { %1640 = vst [vmem:[%s2940_s28 + $0x18] sm:$0xff] %v1632_v42  ;;  %v1633_v34 = vadd.f32 %v2038_v30, %v1625_v46  ;;  %v1626_v15 = vmul.f32 %v1620_v54, %v1610_v16 }
 0x54d   : > { %v1614_v62 = vpop.f32.mrf.mxu1 }
 0x54e   : > { %1641 = vst [vmem:[%s2940_s28 + $0x20] sm:$0xff] %v1633_v34  ;;  %v1634_v23 = vadd.f32 %v2039_v52, %v1626_v15  ;;  %v1627_v36 = vmul.f32 %v1620_v54, %v1614_v62 }
 0x54f   : > { %v1616_v9 = vpop.f32.mrf.mxu1 }
 0x550   : > { %1642 = vst [vmem:[%s2940_s28 + $0x28] sm:$0xff] %v1634_v23  ;;  %v1635_v1 = vadd.f32 %v2040_v51, %v1627_v36  ;;  %v1628_v20 = vmul.f32 %v1620_v54, %v1616_v9 }
 0x552   : > { %1643 = vst [vmem:[%s2940_s28 + $0x30] sm:$0xff] %v1635_v1  ;;  %v1636_v48 = vadd.f32 %v2041_v0, %v1628_v20 }
 0x554   : > { %1644 = vst [vmem:[%s2940_s28 + $0x38] sm:$0xff] %v1636_v48 }
 0x555   : > { %2083 = shalt.err (!%p2080_p10)
}
 0x556   : > { %s2084_s20 = scalar_lea.hbm %s2961_s14, 1024  ;;  %s2088_s28 = scalar_lea.hbm %s3015_s8, 2048 }
 0x557   : > { %p2085_p0 = scmp.ne.s32.totalorder %s2961_s14, %s2084_s20  ;;  %p2089_p1 = scmp.lt.s32.totalorder %s2961_s14, %s3015_s8 }
 0x558   : > { %p2090_p3 = scmp.lt.s32.totalorder %s2088_s28, %s2084_s20 }
 0x559   : > { %p2086_p2 = pnand %p2085_p0, %p3114_p12 }
 0x55a   : > { %p2091_p6 = por %p2090_p3, %p2089_p1 }
 0x55b   : > { %p2087_p9 = pneg %p2086_p2 }
 0x55d   : > { %p2092_p11 = pnand %p2091_p6, %p2087_p9 }
 0x55f   : > { %2095 = shalt.err (!%p2092_p11)
}
 0x560   : > { %s2142_s26 = smov 256   ;;  %s2143_s13 = smov 16  }
 0x561   : > { %1790 = dma.vmem_to_hbm [thread:$0]  (%p3114_p12), %s2954_s16, 1024, %s2961_s14, %s1646_s0, %s2142_s26, %s2142_s26, %s2143_s13  }
 0x562 PF: > { %s1674_s21 = sand.u32 1, %s2122_s29   ;;  %p3115_p13 = scmp.ne.s32.totalorder %s3052_s19, 0 }
 0x563   : > { %p3116_p4 = scmp.ge.s32.totalorder %s2134_s10, 2  ;;  %s1675_s23 = scalar_lea.sflag [#allocation5], %s1674_s21 }
 0x565   : > { %p1797_p5 = pnand %p3116_p4, %p3115_p13 }
 0x567   : > { %p1798_p7 = pneg %p1797_p5 }
 0x569   : > { %2117 = dma.done.wait (%p1798_p7), %s1675_s23, 1024  }
 0x56a   : > { %2119 = vsyncadd (%p1798_p7), %s1675_s23, 4294966272  ;;  %p22_p8 = scmp.ge.s32.totalorder %s2217_s12, 4   ;;  %s3117_s29 = smov %s2126_s30 }
 0x56b   : > { %s3118_s30 = smov %s2130_s9  ;;  %s3119_s9 = smov %s2229_s15 }
 0x56c   : > { %s3120_s10 = smov %s2217_s12  ;;  %24 = sbr.rel (!%p22_p8) target bundleno = 7 (0x7), region = 97 }
 0x571   :  { %1680 = vsyncpa [#allocation4], 1 }
 0x572   :  { %1682 = vsyncpa [#allocation4 + $0x1], 1 }
 0x573   :  { %1683 = vsyncpa [#allocation5], 1 }
 0x574   :  { %1685 = vsyncpa [#allocation5 + $0x1], 1 }

</bundles_post_ra>
